<compile_context>
chip_gen: v5e
topology: v5e:2x2
jax: 0.10.0
libtpu: 0.0.40
codegen_flags: <defaults>
</compile_context>

<pallas_src>
import jax
import jax.numpy as jnp
from jax.experimental import pallas as pl
from jax.experimental.pallas import tpu as pltpu


# ----------------------------------------------------------------------------
# Fused conv pipeline kernel:
#   [1x1 conv] -> depthwise KxK over (H,W) -> (D,W) -> (D,H) -> [1x1 conv]
# plus per-batch per-channel sum / sum-of-squares for BatchNorm.
# ----------------------------------------------------------------------------
def _sepall3d_conv_pallas(x2d, coords, p1, p2, p3, psw, *, dims, ksize, cin, cout):
    """x2d: (B, cin, S) with S = D*H*W (lane dim, dense).
    coords: (3, S) int32 rows = (d, h, w) coordinate of each flattened voxel.
    p1/p2/p3: (chn, K*K+1) = depthwise taps (row-major) + bias.
    psw: (cout, cin+1) = 1x1 weights + bias."""
    B, Cin, S = x2d.shape
    D, H, W = dims
    K = ksize
    R = K // 2
    Cc = min(cin, cout)
    Co = cout
    sD, sH, sW = H * W, W, 1

    def kernel(x_ref, cd_ref, p1_ref, p2_ref, p3_ref, psw_ref,
               y_ref, sum_ref, sq_ref):
        f32 = jnp.float32
        xv = x_ref[...].astype(f32)                       # (Cin, S), cast once

        cd = cd_ref[...]                                  # (3, S) int32
        d_i, h_i, w_i = cd[0:1, :], cd[1:2, :], cd[2:3, :]

        def edge_masks(coord, size):
            # mask[o][f] == 1.0 iff 0 <= coord[f] + o < size (zero padding)
            m = {}
            for o in range(-R, R + 1):
                if o == 0:
                    continue
                m[o] = jnp.logical_and(coord >= -o,
                                       coord <= size - 1 - o).astype(f32)
            return m

        mD, mH, mW = edge_masks(d_i, D), edge_masks(h_i, H), edge_masks(w_i, W)

        def shift(v, s):
            # out[:, f] = v[:, f + s]; circular wrap lands only on masked taps.
            s = s % S
            if s == 0:
                return v
            return jnp.concatenate([v[:, s:], v[:, :s]], axis=1)

        def dwconv(v, p_ref, strideA, maskA, strideB, maskB):
            # depthwise KxK conv over the (A, B) plane; p_ref: (C, K*K + 1)
            p = p_ref[...].astype(f32)                    # loaded/cast once
            acc = jnp.zeros_like(v)
            for ka in range(K):
                da = ka - R
                for kb in range(K):
                    db = kb - R
                    src = shift(v, da * strideA + db * strideB)
                    if da != 0 and db != 0:
                        src = src * (maskA[da] * maskB[db])
                    elif da != 0:
                        src = src * maskA[da]
                    elif db != 0:
                        src = src * maskB[db]
                    t = ka * K + kb
                    acc = acc + src * p[:, t:t + 1]
            return acc + p[:, K * K:K * K + 1]            # conv bias

        def spacewise(v):
            # 1x1 conv (channel mixing).  MXU matmul when channel counts are
            # comfortable; VPU broadcast-MAC loop for very small channel dims.
            ci = v.shape[0]
            p = psw_ref[...].astype(f32)                  # (Co, cin+1)
            wsw, bsw = p[:, :ci], p[:, ci:ci + 1]
            if min(ci, Co) >= 8:
                return jnp.dot(wsw, v, preferred_element_type=f32) + bsw
            acc = jnp.zeros((Co, S), f32)
            for c in range(ci):
                acc = acc + v[c:c + 1, :] * wsw[:, c:c + 1]
            return acc + bsw

        f = xv
        if cin > cout:                                    # module: 1x1 first
            f = spacewise(f)                              # (Cc, S)
        f = dwconv(f, p1_ref, sH, mH, sW, mW)             # conv over (H, W)
        f = dwconv(f, p2_ref, sD, mD, sW, mW)             # conv over (D, W)
        f = dwconv(f, p3_ref, sD, mD, sH, mH)             # conv over (D, H)
        if cin <= cout:                                   # module: 1x1 last
            f = spacewise(f)                              # (Co, S)

        y_ref[...] = f.astype(y_ref.dtype)                # lane-dense store
        sum_ref[...] = jnp.sum(f, axis=1, keepdims=True)  # BN partial stats
        sq_ref[...] = jnp.sum(f * f, axis=1, keepdims=True)

    out_shape = (
        jax.ShapeDtypeStruct((B, Co, S), x2d.dtype),
        jax.ShapeDtypeStruct((B, Co, 1), jnp.float32),
        jax.ShapeDtypeStruct((B, Co, 1), jnp.float32),
    )
    return pl.pallas_call(
        kernel,
        out_shape=out_shape,
        grid=(B,),
        in_specs=[
            pl.BlockSpec((None, Cin, S), lambda n: (n, 0, 0)),
            pl.BlockSpec((3, S), lambda n: (0, 0)),
            pl.BlockSpec((Cc, K * K + 1), lambda n: (0, 0)),
            pl.BlockSpec((Cc, K * K + 1), lambda n: (0, 0)),
            pl.BlockSpec((Cc, K * K + 1), lambda n: (0, 0)),
            pl.BlockSpec((Co, cin + 1), lambda n: (0, 0)),
        ],
        out_specs=(
            pl.BlockSpec((None, Co, S), lambda n: (n, 0, 0)),
            pl.BlockSpec((None, Co, 1), lambda n: (n, 0, 0)),
            pl.BlockSpec((None, Co, 1), lambda n: (n, 0, 0)),
        ),
        compiler_params=pltpu.CompilerParams(
            dimension_semantics=("parallel",)),
    )(x2d, coords, p1, p2, p3, psw)


# ----------------------------------------------------------------------------
# Blocked BatchNorm-apply (+optional ReLU): y * scale[c] + shift[c]
# ----------------------------------------------------------------------------
def _scale_shift_act_pallas(y2d, scale, shift, relu):
    B, Co, S = y2d.shape
    sc = scale.reshape(Co, 1).astype(jnp.float32)
    sh = shift.reshape(Co, 1).astype(jnp.float32)

    def kernel(y_ref, sc_ref, sh_ref, o_ref):
        o = y_ref[...].astype(jnp.float32) * sc_ref[...] + sh_ref[...]
        if relu:
            o = jnp.maximum(o, 0.0)
        o_ref[...] = o.astype(o_ref.dtype)

    return pl.pallas_call(
        kernel,
        out_shape=jax.ShapeDtypeStruct((B, Co, S), y2d.dtype),
        grid=(B,),
        in_specs=[
            pl.BlockSpec((None, Co, S), lambda n: (n, 0, 0)),
            pl.BlockSpec((Co, 1), lambda n: (0, 0)),
            pl.BlockSpec((Co, 1), lambda n: (0, 0)),
        ],
        out_specs=pl.BlockSpec((None, Co, S), lambda n: (n, 0, 0)),
        compiler_params=pltpu.CompilerParams(
            dimension_semantics=("parallel",)),
    )(y2d, sc, sh)


# ----------------------------------------------------------------------------
# Module wrapper (parameters + thin glue; no HBM transposes / pads)
# ----------------------------------------------------------------------------
class ConvolutionSepAll3DLayerPallas:
    def __init__(self, in_channels, out_channels, kernel_size=3, padding=1,
                 batch_norm=True, acti_relu=True, key=None):
        assert kernel_size % 2 == 1 and padding == (kernel_size - 1) // 2, \
            "module's .view() calls require shape-preserving convs"
        self.cin, self.cout = in_channels, out_channels
        self.k, self.pad = kernel_size, padding
        self.batch_norm, self.acti_relu = batch_norm, acti_relu
        chn = min(in_channels, out_channels)
        key = jax.random.PRNGKey(42) if key is None else key
        ks = jax.random.split(key, 10)
        s = 0.2
        self.w1 = s * jax.random.normal(ks[0], (chn, kernel_size, kernel_size), jnp.float32)
        self.b1 = s * jax.random.normal(ks[1], (chn,), jnp.float32)
        self.w2 = s * jax.random.normal(ks[2], (chn, kernel_size, kernel_size), jnp.float32)
        self.b2 = s * jax.random.normal(ks[3], (chn,), jnp.float32)
        self.w3 = s * jax.random.normal(ks[4], (chn, kernel_size, kernel_size), jnp.float32)
        self.b3 = s * jax.random.normal(ks[5], (chn,), jnp.float32)
        self.wsw = s * jax.random.normal(ks[6], (out_channels, in_channels), jnp.float32)
        self.bsw = s * jax.random.normal(ks[7], (out_channels,), jnp.float32)
        self.gamma = 1.0 + s * jax.random.normal(ks[8], (out_channels,), jnp.float32)
        self.beta = s * jax.random.normal(ks[9], (out_channels,), jnp.float32)
        # packed per-stage parameter blocks (taps + bias) for the fused kernel
        k2 = kernel_size * kernel_size
        self.p1 = jnp.concatenate([self.w1.reshape(chn, k2), self.b1[:, None]], axis=1)
        self.p2 = jnp.concatenate([self.w2.reshape(chn, k2), self.b2[:, None]], axis=1)
        self.p3 = jnp.concatenate([self.w3.reshape(chn, k2), self.b3[:, None]], axis=1)
        self.psw = jnp.concatenate([self.wsw, self.bsw[:, None]], axis=1)

    def __call__(self, x):
        B, C, D, H, W = x.shape
        assert C == self.cin
        Co = self.cout
        S = D * H * W
        x2d = x.reshape(B, C, S)          # contiguous -> free reshape, no copy

        dd, hh, ww = jnp.meshgrid(jnp.arange(D, dtype=jnp.int32),
                                  jnp.arange(H, dtype=jnp.int32),
                                  jnp.arange(W, dtype=jnp.int32), indexing="ij")
        coords = jnp.stack([dd.reshape(-1), hh.reshape(-1), ww.reshape(-1)], axis=0)

        y2d, ysum, ysq = _sepall3d_conv_pallas(
            x2d, coords, self.p1, self.p2, self.p3, self.psw,
            dims=(D, H, W), ksize=self.k, cin=self.cin, cout=self.cout)

        if self.batch_norm:
            # tiny cross-batch reduction of per-block partials (plain JAX)
            cnt = float(B * S)
            tot = jnp.sum(ysum[:, :, 0], axis=0)              # (Co,)
            tot2 = jnp.sum(ysq[:, :, 0], axis=0)
            mean = tot / cnt
            var = jnp.maximum(tot2 / cnt - mean * mean, 0.0)   # biased (training BN)
            scale = self.gamma * jax.lax.rsqrt(var + 1e-5)
            shift = self.beta - mean * scale
            y2d = _scale_shift_act_pallas(y2d, scale, shift, self.acti_relu)
        elif self.acti_relu:
            y2d = _scale_shift_act_pallas(y2d, jnp.ones((Co,), jnp.float32),
                                          jnp.zeros((Co,), jnp.float32), True)
        return y2d.reshape(B, Co, D, H, W)


# ----------------------------------------------------------------------------
# Pure-JAX reference (mirrors the PyTorch permute/view forward exactly)
# ----------------------------------------------------------------------------
def ref_forward(x, layer):
    pad = layer.pad

    def dw(x4, w, b):
        wf = w[:, None, :, :]  # (C, 1, K, K), groups = C
        y = jax.lax.conv_general_dilated(
            x4, wf, window_strides=(1, 1), padding=[(pad, pad), (pad, pad)],
            dimension_numbers=("NCHW", "OIHW", "NCHW"),
            feature_group_count=x4.shape[1])
        return y + b[None, :, None, None]

    def pw(x4, w, b):
        return jnp.einsum("oc,nchw->nohw", w, x4) + b[None, :, None, None]

    B, C, D, H, W = x.shape
    Cc, Co = min(layer.cin, layer.cout), layer.cout
    f0 = jnp.transpose(x, (0, 2, 1, 3, 4)).reshape(B * D, C, H, W)
    if layer.cin > layer.cout:
        f0 = pw(f0, layer.wsw, layer.bsw)
    f1 = dw(f0, layer.w1, layer.b1)
    H1, W1 = f1.shape[-2:]
    f2 = f1.reshape(B, D, Cc, H1, W1).transpose(0, 3, 2, 1, 4).reshape(B * H1, Cc, D, W1)
    f2 = dw(f2, layer.w2, layer.b2)
    D1, W2 = f2.shape[-2:]
    f3 = f2.reshape(B, H1, Cc, D1, W2).transpose(0, 4, 2, 3, 1).reshape(B * W2, Cc, D1, H1)
    f3 = dw(f3, layer.w3, layer.b3)
    D2, H2 = f3.shape[-2:]
    if layer.cin <= layer.cout:
        f3 = pw(f3, layer.wsw, layer.bsw)
    out = f3.reshape(B, W2, Co, D2, H2).transpose(0, 2, 3, 4, 1)
    if layer.batch_norm:
        mean = out.mean(axis=(0, 2, 3, 4), keepdims=True)
        var = jnp.square(out - mean).mean(axis=(0, 2, 3, 4), keepdims=True)
        out = (out - mean) * jax.lax.rsqrt(var + 1e-5) \
            * layer.gamma[None, :, None, None, None] + layer.beta[None, :, None, None, None]
    if layer.acti_relu:
        out = jnp.maximum(out, 0.0)
    return out


if __name__ == "__main__":
    key = jax.random.PRNGKey(0)

    configs = [
        # covers both placements of the 1x1 space-wise conv
        dict(cin=8, cout=8, B=2, D=4, H=8, W=16),   # MXU 1x1 path,  S = 512
        dict(cin=8, cout=4, B=2, D=8, H=4, W=8),    # 1x1-first path, S = 256
    ]
    for i, cfg in enumerate(configs):
        kx, key = jax.random.split(key)
        x = jax.random.normal(
            kx, (cfg["B"], cfg["cin"], cfg["D"], cfg["H"], cfg["W"]), jnp.float32)
        layer = ConvolutionSepAll3DLayerPallas(
            cfg["cin"], cfg["cout"], kernel_size=3, padding=1,
            batch_norm=True, acti_relu=True, key=jax.random.PRNGKey(100 + i))

        fwd = jax.jit(lambda inp, lyr=layer: lyr(inp))
        out = jax.block_until_ready(fwd(x))
        assert out.shape == (cfg["B"], cfg["cout"], cfg["D"], cfg["H"], cfg["W"])

        ref = jax.block_until_ready(ref_forward(x, layer))
        err = float(jnp.max(jnp.abs(out - ref)))
        # fused-kernel sum/sumsq BN stats vs ref's direct mean/var: small slack
        assert err < 2e-4, f"config {i}: mismatch vs reference: {err}"

    print("KERNEL_OK")
</pallas_src>

<mosaic_0001>
module attributes {stable_mosaic.version = 11 : i64} {
  func.func @kernel(%arg0: i32, %arg1: memref<1x8x512xf32, #tpu.memory_space<vmem>>, %arg2: memref<3x512xi32, #tpu.memory_space<vmem>>, %arg3: memref<8x10xf32, #tpu.memory_space<vmem>>, %arg4: memref<8x10xf32, #tpu.memory_space<vmem>>, %arg5: memref<8x10xf32, #tpu.memory_space<vmem>>, %arg6: memref<8x9xf32, #tpu.memory_space<vmem>>, %arg7: memref<1x8x512xf32, #tpu.memory_space<vmem>>, %arg8: memref<1x8x1xf32, #tpu.memory_space<vmem>>, %arg9: memref<1x8x1xf32, #tpu.memory_space<vmem>>) attributes {dimension_semantics = [#tpu.dimension_semantics<parallel>], iteration_bounds = array<i64: 2>, scalar_prefetch = 0 : i64, scratch_operands = 0 : i64, tpu.core_type = #tpu.core_type<tc>, window_params = [{transform_indices = @transform_0, window_bounds = array<i64: 1, 8, 512>}, {pipeline_mode = #tpu.pipeline_mode<synchronous>, transform_indices = @transform_1, window_bounds = array<i64: 3, 512>}, {pipeline_mode = #tpu.pipeline_mode<synchronous>, transform_indices = @transform_2, window_bounds = array<i64: 8, 10>}, {pipeline_mode = #tpu.pipeline_mode<synchronous>, transform_indices = @transform_3, window_bounds = array<i64: 8, 10>}, {pipeline_mode = #tpu.pipeline_mode<synchronous>, transform_indices = @transform_4, window_bounds = array<i64: 8, 10>}, {pipeline_mode = #tpu.pipeline_mode<synchronous>, transform_indices = @transform_5, window_bounds = array<i64: 8, 9>}, {transform_indices = @transform_6, window_bounds = array<i64: 1, 8, 512>}, {transform_indices = @transform_7, window_bounds = array<i64: 1, 8, 1>}, {transform_indices = @transform_8, window_bounds = array<i64: 1, 8, 1>}]} {
    %c0 = arith.constant 0 : index
    %c0_0 = arith.constant 0 : index
    %c0_1 = arith.constant 0 : index
    %0 = vector.load %arg1[%c0, %c0_0, %c0_1] : memref<1x8x512xf32, #tpu.memory_space<vmem>>, vector<1x8x512xf32>
    %1 = vector.shape_cast %0 : vector<1x8x512xf32> to vector<8x512xf32>
    %c0_2 = arith.constant 0 : index
    %c0_3 = arith.constant 0 : index
    %2 = vector.load %arg2[%c0_2, %c0_3] : memref<3x512xi32, #tpu.memory_space<vmem>>, vector<3x512xi32>
    %3 = vector.extract_strided_slice %2 {offsets = [0, 0], sizes = [1, 512], strides = [1, 1]} : vector<3x512xi32> to vector<1x512xi32>
    %4 = vector.extract_strided_slice %2 {offsets = [1, 0], sizes = [1, 512], strides = [1, 1]} : vector<3x512xi32> to vector<1x512xi32>
    %5 = vector.extract_strided_slice %2 {offsets = [2, 0], sizes = [1, 512], strides = [1, 1]} : vector<3x512xi32> to vector<1x512xi32>
    %c1_i32 = arith.constant 1 : i32
    %6 = vector.broadcast %c1_i32 : i32 to vector<1x512xi32>
    %7 = arith.cmpi sge, %3, %6 : vector<1x512xi32>
    %c4_i32 = arith.constant 4 : i32
    %8 = vector.broadcast %c4_i32 : i32 to vector<1x512xi32>
    %9 = arith.cmpi sle, %3, %8 : vector<1x512xi32>
    %10 = arith.andi %7, %9 : vector<1x512xi1>
    %11 = arith.extui %10 : vector<1x512xi1> to vector<1x512xi32>
    %12 = arith.sitofp %11 : vector<1x512xi32> to vector<1x512xf32>
    %c-1_i32 = arith.constant -1 : i32
    %13 = vector.broadcast %c-1_i32 : i32 to vector<1x512xi32>
    %14 = arith.cmpi sge, %3, %13 : vector<1x512xi32>
    %c2_i32 = arith.constant 2 : i32
    %15 = vector.broadcast %c2_i32 : i32 to vector<1x512xi32>
    %16 = arith.cmpi sle, %3, %15 : vector<1x512xi32>
    %17 = arith.andi %14, %16 : vector<1x512xi1>
    %18 = arith.extui %17 : vector<1x512xi1> to vector<1x512xi32>
    %19 = arith.sitofp %18 : vector<1x512xi32> to vector<1x512xf32>
    %c1_i32_4 = arith.constant 1 : i32
    %20 = vector.broadcast %c1_i32_4 : i32 to vector<1x512xi32>
    %21 = arith.cmpi sge, %4, %20 : vector<1x512xi32>
    %c8_i32 = arith.constant 8 : i32
    %22 = vector.broadcast %c8_i32 : i32 to vector<1x512xi32>
    %23 = arith.cmpi sle, %4, %22 : vector<1x512xi32>
    %24 = arith.andi %21, %23 : vector<1x512xi1>
    %25 = arith.extui %24 : vector<1x512xi1> to vector<1x512xi32>
    %26 = arith.sitofp %25 : vector<1x512xi32> to vector<1x512xf32>
    %c-1_i32_5 = arith.constant -1 : i32
    %27 = vector.broadcast %c-1_i32_5 : i32 to vector<1x512xi32>
    %28 = arith.cmpi sge, %4, %27 : vector<1x512xi32>
    %c6_i32 = arith.constant 6 : i32
    %29 = vector.broadcast %c6_i32 : i32 to vector<1x512xi32>
    %30 = arith.cmpi sle, %4, %29 : vector<1x512xi32>
    %31 = arith.andi %28, %30 : vector<1x512xi1>
    %32 = arith.extui %31 : vector<1x512xi1> to vector<1x512xi32>
    %33 = arith.sitofp %32 : vector<1x512xi32> to vector<1x512xf32>
    %c1_i32_6 = arith.constant 1 : i32
    %34 = vector.broadcast %c1_i32_6 : i32 to vector<1x512xi32>
    %35 = arith.cmpi sge, %5, %34 : vector<1x512xi32>
    %c16_i32 = arith.constant 16 : i32
    %36 = vector.broadcast %c16_i32 : i32 to vector<1x512xi32>
    %37 = arith.cmpi sle, %5, %36 : vector<1x512xi32>
    %38 = arith.andi %35, %37 : vector<1x512xi1>
    %39 = arith.extui %38 : vector<1x512xi1> to vector<1x512xi32>
    %40 = arith.sitofp %39 : vector<1x512xi32> to vector<1x512xf32>
    %c-1_i32_7 = arith.constant -1 : i32
    %41 = vector.broadcast %c-1_i32_7 : i32 to vector<1x512xi32>
    %42 = arith.cmpi sge, %5, %41 : vector<1x512xi32>
    %c14_i32 = arith.constant 14 : i32
    %43 = vector.broadcast %c14_i32 : i32 to vector<1x512xi32>
    %44 = arith.cmpi sle, %5, %43 : vector<1x512xi32>
    %45 = arith.andi %42, %44 : vector<1x512xi1>
    %46 = arith.extui %45 : vector<1x512xi1> to vector<1x512xi32>
    %47 = arith.sitofp %46 : vector<1x512xi32> to vector<1x512xf32>
    %c0_8 = arith.constant 0 : index
    %c0_9 = arith.constant 0 : index
    %48 = vector.load %arg3[%c0_8, %c0_9] : memref<8x10xf32, #tpu.memory_space<vmem>>, vector<8x10xf32>
    %cst = arith.constant 0.000000e+00 : f32
    %49 = vector.broadcast %cst : f32 to vector<8x512xf32>
    %50 = vector.extract_strided_slice %1 {offsets = [0, 495], sizes = [8, 17], strides = [1, 1]} : vector<8x512xf32> to vector<8x17xf32>
    %51 = vector.extract_strided_slice %1 {offsets = [0, 0], sizes = [8, 495], strides = [1, 1]} : vector<8x512xf32> to vector<8x495xf32>
    %52 = tpu.concatenate %50, %51 in 1 : vector<8x17xf32>, vector<8x495xf32> -> vector<8x512xf32>
    %53 = arith.mulf %26, %40 : vector<1x512xf32>
    %54 = vector.broadcast %53 : vector<1x512xf32> to vector<8x512xf32>
    %55 = arith.mulf %52, %54 : vector<8x512xf32>
    %56 = vector.extract_strided_slice %48 {offsets = [0, 0], sizes = [8, 1], strides = [1, 1]} : vector<8x10xf32> to vector<8x1xf32>
    %57 = vector.broadcast %56 : vector<8x1xf32> to vector<8x512xf32>
    %58 = arith.mulf %55, %57 : vector<8x512xf32>
    %59 = arith.addf %49, %58 : vector<8x512xf32>
    %60 = vector.extract_strided_slice %1 {offsets = [0, 496], sizes = [8, 16], strides = [1, 1]} : vector<8x512xf32> to vector<8x16xf32>
    %61 = vector.extract_strided_slice %1 {offsets = [0, 0], sizes = [8, 496], strides = [1, 1]} : vector<8x512xf32> to vector<8x496xf32>
    %62 = tpu.concatenate %60, %61 in 1 : vector<8x16xf32>, vector<8x496xf32> -> vector<8x512xf32>
    %63 = vector.broadcast %26 : vector<1x512xf32> to vector<8x512xf32>
    %64 = arith.mulf %62, %63 : vector<8x512xf32>
    %65 = vector.extract_strided_slice %48 {offsets = [0, 1], sizes = [8, 1], strides = [1, 1]} : vector<8x10xf32> to vector<8x1xf32>
    %66 = vector.broadcast %65 : vector<8x1xf32> to vector<8x512xf32>
    %67 = arith.mulf %64, %66 : vector<8x512xf32>
    %68 = arith.addf %59, %67 : vector<8x512xf32>
    %69 = vector.extract_strided_slice %1 {offsets = [0, 497], sizes = [8, 15], strides = [1, 1]} : vector<8x512xf32> to vector<8x15xf32>
    %70 = vector.extract_strided_slice %1 {offsets = [0, 0], sizes = [8, 497], strides = [1, 1]} : vector<8x512xf32> to vector<8x497xf32>
    %71 = tpu.concatenate %69, %70 in 1 : vector<8x15xf32>, vector<8x497xf32> -> vector<8x512xf32>
    %72 = arith.mulf %26, %47 : vector<1x512xf32>
    %73 = vector.broadcast %72 : vector<1x512xf32> to vector<8x512xf32>
    %74 = arith.mulf %71, %73 : vector<8x512xf32>
    %75 = vector.extract_strided_slice %48 {offsets = [0, 2], sizes = [8, 1], strides = [1, 1]} : vector<8x10xf32> to vector<8x1xf32>
    %76 = vector.broadcast %75 : vector<8x1xf32> to vector<8x512xf32>
    %77 = arith.mulf %74, %76 : vector<8x512xf32>
    %78 = arith.addf %68, %77 : vector<8x512xf32>
    %79 = vector.extract_strided_slice %1 {offsets = [0, 511], sizes = [8, 1], strides = [1, 1]} : vector<8x512xf32> to vector<8x1xf32>
    %80 = vector.extract_strided_slice %1 {offsets = [0, 0], sizes = [8, 511], strides = [1, 1]} : vector<8x512xf32> to vector<8x511xf32>
    %81 = tpu.concatenate %79, %80 in 1 : vector<8x1xf32>, vector<8x511xf32> -> vector<8x512xf32>
    %82 = vector.broadcast %40 : vector<1x512xf32> to vector<8x512xf32>
    %83 = arith.mulf %81, %82 : vector<8x512xf32>
    %84 = vector.extract_strided_slice %48 {offsets = [0, 3], sizes = [8, 1], strides = [1, 1]} : vector<8x10xf32> to vector<8x1xf32>
    %85 = vector.broadcast %84 : vector<8x1xf32> to vector<8x512xf32>
    %86 = arith.mulf %83, %85 : vector<8x512xf32>
    %87 = arith.addf %78, %86 : vector<8x512xf32>
    %88 = vector.extract_strided_slice %48 {offsets = [0, 4], sizes = [8, 1], strides = [1, 1]} : vector<8x10xf32> to vector<8x1xf32>
    %89 = vector.broadcast %88 : vector<8x1xf32> to vector<8x512xf32>
    %90 = arith.mulf %1, %89 : vector<8x512xf32>
    %91 = arith.addf %87, %90 : vector<8x512xf32>
    %92 = vector.extract_strided_slice %1 {offsets = [0, 1], sizes = [8, 511], strides = [1, 1]} : vector<8x512xf32> to vector<8x511xf32>
    %93 = vector.extract_strided_slice %1 {offsets = [0, 0], sizes = [8, 1], strides = [1, 1]} : vector<8x512xf32> to vector<8x1xf32>
    %94 = tpu.concatenate %92, %93 in 1 : vector<8x511xf32>, vector<8x1xf32> -> vector<8x512xf32>
    %95 = vector.broadcast %47 : vector<1x512xf32> to vector<8x512xf32>
    %96 = arith.mulf %94, %95 : vector<8x512xf32>
    %97 = vector.extract_strided_slice %48 {offsets = [0, 5], sizes = [8, 1], strides = [1, 1]} : vector<8x10xf32> to vector<8x1xf32>
    %98 = vector.broadcast %97 : vector<8x1xf32> to vector<8x512xf32>
    %99 = arith.mulf %96, %98 : vector<8x512xf32>
    %100 = arith.addf %91, %99 : vector<8x512xf32>
    %101 = vector.extract_strided_slice %1 {offsets = [0, 15], sizes = [8, 497], strides = [1, 1]} : vector<8x512xf32> to vector<8x497xf32>
    %102 = vector.extract_strided_slice %1 {offsets = [0, 0], sizes = [8, 15], strides = [1, 1]} : vector<8x512xf32> to vector<8x15xf32>
    %103 = tpu.concatenate %101, %102 in 1 : vector<8x497xf32>, vector<8x15xf32> -> vector<8x512xf32>
    %104 = arith.mulf %33, %40 : vector<1x512xf32>
    %105 = vector.broadcast %104 : vector<1x512xf32> to vector<8x512xf32>
    %106 = arith.mulf %103, %105 : vector<8x512xf32>
    %107 = vector.extract_strided_slice %48 {offsets = [0, 6], sizes = [8, 1], strides = [1, 1]} : vector<8x10xf32> to vector<8x1xf32>
    %108 = vector.broadcast %107 : vector<8x1xf32> to vector<8x512xf32>
    %109 = arith.mulf %106, %108 : vector<8x512xf32>
    %110 = arith.addf %100, %109 : vector<8x512xf32>
    %111 = vector.extract_strided_slice %1 {offsets = [0, 16], sizes = [8, 496], strides = [1, 1]} : vector<8x512xf32> to vector<8x496xf32>
    %112 = vector.extract_strided_slice %1 {offsets = [0, 0], sizes = [8, 16], strides = [1, 1]} : vector<8x512xf32> to vector<8x16xf32>
    %113 = tpu.concatenate %111, %112 in 1 : vector<8x496xf32>, vector<8x16xf32> -> vector<8x512xf32>
    %114 = vector.broadcast %33 : vector<1x512xf32> to vector<8x512xf32>
    %115 = arith.mulf %113, %114 : vector<8x512xf32>
    %116 = vector.extract_strided_slice %48 {offsets = [0, 7], sizes = [8, 1], strides = [1, 1]} : vector<8x10xf32> to vector<8x1xf32>
    %117 = vector.broadcast %116 : vector<8x1xf32> to vector<8x512xf32>
    %118 = arith.mulf %115, %117 : vector<8x512xf32>
    %119 = arith.addf %110, %118 : vector<8x512xf32>
    %120 = vector.extract_strided_slice %1 {offsets = [0, 17], sizes = [8, 495], strides = [1, 1]} : vector<8x512xf32> to vector<8x495xf32>
    %121 = vector.extract_strided_slice %1 {offsets = [0, 0], sizes = [8, 17], strides = [1, 1]} : vector<8x512xf32> to vector<8x17xf32>
    %122 = tpu.concatenate %120, %121 in 1 : vector<8x495xf32>, vector<8x17xf32> -> vector<8x512xf32>
    %123 = arith.mulf %33, %47 : vector<1x512xf32>
    %124 = vector.broadcast %123 : vector<1x512xf32> to vector<8x512xf32>
    %125 = arith.mulf %122, %124 : vector<8x512xf32>
    %126 = vector.extract_strided_slice %48 {offsets = [0, 8], sizes = [8, 1], strides = [1, 1]} : vector<8x10xf32> to vector<8x1xf32>
    %127 = vector.broadcast %126 : vector<8x1xf32> to vector<8x512xf32>
    %128 = arith.mulf %125, %127 : vector<8x512xf32>
    %129 = arith.addf %119, %128 : vector<8x512xf32>
    %130 = vector.extract_strided_slice %48 {offsets = [0, 9], sizes = [8, 1], strides = [1, 1]} : vector<8x10xf32> to vector<8x1xf32>
    %131 = vector.broadcast %130 : vector<8x1xf32> to vector<8x512xf32>
    %132 = arith.addf %129, %131 : vector<8x512xf32>
    %c0_10 = arith.constant 0 : index
    %c0_11 = arith.constant 0 : index
    %133 = vector.load %arg4[%c0_10, %c0_11] : memref<8x10xf32, #tpu.memory_space<vmem>>, vector<8x10xf32>
    %cst_12 = arith.constant 0.000000e+00 : f32
    %134 = vector.broadcast %cst_12 : f32 to vector<8x512xf32>
    %135 = vector.extract_strided_slice %132 {offsets = [0, 383], sizes = [8, 129], strides = [1, 1]} : vector<8x512xf32> to vector<8x129xf32>
    %136 = vector.extract_strided_slice %132 {offsets = [0, 0], sizes = [8, 383], strides = [1, 1]} : vector<8x512xf32> to vector<8x383xf32>
    %137 = tpu.concatenate %135, %136 in 1 : vector<8x129xf32>, vector<8x383xf32> -> vector<8x512xf32>
    %138 = arith.mulf %12, %40 : vector<1x512xf32>
    %139 = vector.broadcast %138 : vector<1x512xf32> to vector<8x512xf32>
    %140 = arith.mulf %137, %139 : vector<8x512xf32>
    %141 = vector.extract_strided_slice %133 {offsets = [0, 0], sizes = [8, 1], strides = [1, 1]} : vector<8x10xf32> to vector<8x1xf32>
    %142 = vector.broadcast %141 : vector<8x1xf32> to vector<8x512xf32>
    %143 = arith.mulf %140, %142 : vector<8x512xf32>
    %144 = arith.addf %134, %143 : vector<8x512xf32>
    %145 = vector.extract_strided_slice %132 {offsets = [0, 384], sizes = [8, 128], strides = [1, 1]} : vector<8x512xf32> to vector<8x128xf32>
    %146 = vector.extract_strided_slice %132 {offsets = [0, 0], sizes = [8, 384], strides = [1, 1]} : vector<8x512xf32> to vector<8x384xf32>
    %147 = tpu.concatenate %145, %146 in 1 : vector<8x128xf32>, vector<8x384xf32> -> vector<8x512xf32>
    %148 = vector.broadcast %12 : vector<1x512xf32> to vector<8x512xf32>
    %149 = arith.mulf %147, %148 : vector<8x512xf32>
    %150 = vector.extract_strided_slice %133 {offsets = [0, 1], sizes = [8, 1], strides = [1, 1]} : vector<8x10xf32> to vector<8x1xf32>
    %151 = vector.broadcast %150 : vector<8x1xf32> to vector<8x512xf32>
    %152 = arith.mulf %149, %151 : vector<8x512xf32>
    %153 = arith.addf %144, %152 : vector<8x512xf32>
    %154 = vector.extract_strided_slice %132 {offsets = [0, 385], sizes = [8, 127], strides = [1, 1]} : vector<8x512xf32> to vector<8x127xf32>
    %155 = vector.extract_strided_slice %132 {offsets = [0, 0], sizes = [8, 385], strides = [1, 1]} : vector<8x512xf32> to vector<8x385xf32>
    %156 = tpu.concatenate %154, %155 in 1 : vector<8x127xf32>, vector<8x385xf32> -> vector<8x512xf32>
    %157 = arith.mulf %12, %47 : vector<1x512xf32>
    %158 = vector.broadcast %157 : vector<1x512xf32> to vector<8x512xf32>
    %159 = arith.mulf %156, %158 : vector<8x512xf32>
    %160 = vector.extract_strided_slice %133 {offsets = [0, 2], sizes = [8, 1], strides = [1, 1]} : vector<8x10xf32> to vector<8x1xf32>
    %161 = vector.broadcast %160 : vector<8x1xf32> to vector<8x512xf32>
    %162 = arith.mulf %159, %161 : vector<8x512xf32>
    %163 = arith.addf %153, %162 : vector<8x512xf32>
    %164 = vector.extract_strided_slice %132 {offsets = [0, 511], sizes = [8, 1], strides = [1, 1]} : vector<8x512xf32> to vector<8x1xf32>
    %165 = vector.extract_strided_slice %132 {offsets = [0, 0], sizes = [8, 511], strides = [1, 1]} : vector<8x512xf32> to vector<8x511xf32>
    %166 = tpu.concatenate %164, %165 in 1 : vector<8x1xf32>, vector<8x511xf32> -> vector<8x512xf32>
    %167 = vector.broadcast %40 : vector<1x512xf32> to vector<8x512xf32>
    %168 = arith.mulf %166, %167 : vector<8x512xf32>
    %169 = vector.extract_strided_slice %133 {offsets = [0, 3], sizes = [8, 1], strides = [1, 1]} : vector<8x10xf32> to vector<8x1xf32>
    %170 = vector.broadcast %169 : vector<8x1xf32> to vector<8x512xf32>
    %171 = arith.mulf %168, %170 : vector<8x512xf32>
    %172 = arith.addf %163, %171 : vector<8x512xf32>
    %173 = vector.extract_strided_slice %133 {offsets = [0, 4], sizes = [8, 1], strides = [1, 1]} : vector<8x10xf32> to vector<8x1xf32>
    %174 = vector.broadcast %173 : vector<8x1xf32> to vector<8x512xf32>
    %175 = arith.mulf %132, %174 : vector<8x512xf32>
    %176 = arith.addf %172, %175 : vector<8x512xf32>
    %177 = vector.extract_strided_slice %132 {offsets = [0, 1], sizes = [8, 511], strides = [1, 1]} : vector<8x512xf32> to vector<8x511xf32>
    %178 = vector.extract_strided_slice %132 {offsets = [0, 0], sizes = [8, 1], strides = [1, 1]} : vector<8x512xf32> to vector<8x1xf32>
    %179 = tpu.concatenate %177, %178 in 1 : vector<8x511xf32>, vector<8x1xf32> -> vector<8x512xf32>
    %180 = vector.broadcast %47 : vector<1x512xf32> to vector<8x512xf32>
    %181 = arith.mulf %179, %180 : vector<8x512xf32>
    %182 = vector.extract_strided_slice %133 {offsets = [0, 5], sizes = [8, 1], strides = [1, 1]} : vector<8x10xf32> to vector<8x1xf32>
    %183 = vector.broadcast %182 : vector<8x1xf32> to vector<8x512xf32>
    %184 = arith.mulf %181, %183 : vector<8x512xf32>
    %185 = arith.addf %176, %184 : vector<8x512xf32>
    %186 = vector.extract_strided_slice %132 {offsets = [0, 127], sizes = [8, 385], strides = [1, 1]} : vector<8x512xf32> to vector<8x385xf32>
    %187 = vector.extract_strided_slice %132 {offsets = [0, 0], sizes = [8, 127], strides = [1, 1]} : vector<8x512xf32> to vector<8x127xf32>
    %188 = tpu.concatenate %186, %187 in 1 : vector<8x385xf32>, vector<8x127xf32> -> vector<8x512xf32>
    %189 = arith.mulf %19, %40 : vector<1x512xf32>
    %190 = vector.broadcast %189 : vector<1x512xf32> to vector<8x512xf32>
    %191 = arith.mulf %188, %190 : vector<8x512xf32>
    %192 = vector.extract_strided_slice %133 {offsets = [0, 6], sizes = [8, 1], strides = [1, 1]} : vector<8x10xf32> to vector<8x1xf32>
    %193 = vector.broadcast %192 : vector<8x1xf32> to vector<8x512xf32>
    %194 = arith.mulf %191, %193 : vector<8x512xf32>
    %195 = arith.addf %185, %194 : vector<8x512xf32>
    %196 = vector.extract_strided_slice %132 {offsets = [0, 128], sizes = [8, 384], strides = [1, 1]} : vector<8x512xf32> to vector<8x384xf32>
    %197 = vector.extract_strided_slice %132 {offsets = [0, 0], sizes = [8, 128], strides = [1, 1]} : vector<8x512xf32> to vector<8x128xf32>
    %198 = tpu.concatenate %196, %197 in 1 : vector<8x384xf32>, vector<8x128xf32> -> vector<8x512xf32>
    %199 = vector.broadcast %19 : vector<1x512xf32> to vector<8x512xf32>
    %200 = arith.mulf %198, %199 : vector<8x512xf32>
    %201 = vector.extract_strided_slice %133 {offsets = [0, 7], sizes = [8, 1], strides = [1, 1]} : vector<8x10xf32> to vector<8x1xf32>
    %202 = vector.broadcast %201 : vector<8x1xf32> to vector<8x512xf32>
    %203 = arith.mulf %200, %202 : vector<8x512xf32>
    %204 = arith.addf %195, %203 : vector<8x512xf32>
    %205 = vector.extract_strided_slice %132 {offsets = [0, 129], sizes = [8, 383], strides = [1, 1]} : vector<8x512xf32> to vector<8x383xf32>
    %206 = vector.extract_strided_slice %132 {offsets = [0, 0], sizes = [8, 129], strides = [1, 1]} : vector<8x512xf32> to vector<8x129xf32>
    %207 = tpu.concatenate %205, %206 in 1 : vector<8x383xf32>, vector<8x129xf32> -> vector<8x512xf32>
    %208 = arith.mulf %19, %47 : vector<1x512xf32>
    %209 = vector.broadcast %208 : vector<1x512xf32> to vector<8x512xf32>
    %210 = arith.mulf %207, %209 : vector<8x512xf32>
    %211 = vector.extract_strided_slice %133 {offsets = [0, 8], sizes = [8, 1], strides = [1, 1]} : vector<8x10xf32> to vector<8x1xf32>
    %212 = vector.broadcast %211 : vector<8x1xf32> to vector<8x512xf32>
    %213 = arith.mulf %210, %212 : vector<8x512xf32>
    %214 = arith.addf %204, %213 : vector<8x512xf32>
    %215 = vector.extract_strided_slice %133 {offsets = [0, 9], sizes = [8, 1], strides = [1, 1]} : vector<8x10xf32> to vector<8x1xf32>
    %216 = vector.broadcast %215 : vector<8x1xf32> to vector<8x512xf32>
    %217 = arith.addf %214, %216 : vector<8x512xf32>
    %c0_13 = arith.constant 0 : index
    %c0_14 = arith.constant 0 : index
    %218 = vector.load %arg5[%c0_13, %c0_14] : memref<8x10xf32, #tpu.memory_space<vmem>>, vector<8x10xf32>
    %cst_15 = arith.constant 0.000000e+00 : f32
    %219 = vector.broadcast %cst_15 : f32 to vector<8x512xf32>
    %220 = vector.extract_strided_slice %217 {offsets = [0, 368], sizes = [8, 144], strides = [1, 1]} : vector<8x512xf32> to vector<8x144xf32>
    %221 = vector.extract_strided_slice %217 {offsets = [0, 0], sizes = [8, 368], strides = [1, 1]} : vector<8x512xf32> to vector<8x368xf32>
    %222 = tpu.concatenate %220, %221 in 1 : vector<8x144xf32>, vector<8x368xf32> -> vector<8x512xf32>
    %223 = arith.mulf %12, %26 : vector<1x512xf32>
    %224 = vector.broadcast %223 : vector<1x512xf32> to vector<8x512xf32>
    %225 = arith.mulf %222, %224 : vector<8x512xf32>
    %226 = vector.extract_strided_slice %218 {offsets = [0, 0], sizes = [8, 1], strides = [1, 1]} : vector<8x10xf32> to vector<8x1xf32>
    %227 = vector.broadcast %226 : vector<8x1xf32> to vector<8x512xf32>
    %228 = arith.mulf %225, %227 : vector<8x512xf32>
    %229 = arith.addf %219, %228 : vector<8x512xf32>
    %230 = vector.extract_strided_slice %217 {offsets = [0, 384], sizes = [8, 128], strides = [1, 1]} : vector<8x512xf32> to vector<8x128xf32>
    %231 = vector.extract_strided_slice %217 {offsets = [0, 0], sizes = [8, 384], strides = [1, 1]} : vector<8x512xf32> to vector<8x384xf32>
    %232 = tpu.concatenate %230, %231 in 1 : vector<8x128xf32>, vector<8x384xf32> -> vector<8x512xf32>
    %233 = vector.broadcast %12 : vector<1x512xf32> to vector<8x512xf32>
    %234 = arith.mulf %232, %233 : vector<8x512xf32>
    %235 = vector.extract_strided_slice %218 {offsets = [0, 1], sizes = [8, 1], strides = [1, 1]} : vector<8x10xf32> to vector<8x1xf32>
    %236 = vector.broadcast %235 : vector<8x1xf32> to vector<8x512xf32>
    %237 = arith.mulf %234, %236 : vector<8x512xf32>
    %238 = arith.addf %229, %237 : vector<8x512xf32>
    %239 = vector.extract_strided_slice %217 {offsets = [0, 400], sizes = [8, 112], strides = [1, 1]} : vector<8x512xf32> to vector<8x112xf32>
    %240 = vector.extract_strided_slice %217 {offsets = [0, 0], sizes = [8, 400], strides = [1, 1]} : vector<8x512xf32> to vector<8x400xf32>
    %241 = tpu.concatenate %239, %240 in 1 : vector<8x112xf32>, vector<8x400xf32> -> vector<8x512xf32>
    %242 = arith.mulf %12, %33 : vector<1x512xf32>
    %243 = vector.broadcast %242 : vector<1x512xf32> to vector<8x512xf32>
    %244 = arith.mulf %241, %243 : vector<8x512xf32>
    %245 = vector.extract_strided_slice %218 {offsets = [0, 2], sizes = [8, 1], strides = [1, 1]} : vector<8x10xf32> to vector<8x1xf32>
    %246 = vector.broadcast %245 : vector<8x1xf32> to vector<8x512xf32>
    %247 = arith.mulf %244, %246 : vector<8x512xf32>
    %248 = arith.addf %238, %247 : vector<8x512xf32>
    %249 = vector.extract_strided_slice %217 {offsets = [0, 496], sizes = [8, 16], strides = [1, 1]} : vector<8x512xf32> to vector<8x16xf32>
    %250 = vector.extract_strided_slice %217 {offsets = [0, 0], sizes = [8, 496], strides = [1, 1]} : vector<8x512xf32> to vector<8x496xf32>
    %251 = tpu.concatenate %249, %250 in 1 : vector<8x16xf32>, vector<8x496xf32> -> vector<8x512xf32>
    %252 = vector.broadcast %26 : vector<1x512xf32> to vector<8x512xf32>
    %253 = arith.mulf %251, %252 : vector<8x512xf32>
    %254 = vector.extract_strided_slice %218 {offsets = [0, 3], sizes = [8, 1], strides = [1, 1]} : vector<8x10xf32> to vector<8x1xf32>
    %255 = vector.broadcast %254 : vector<8x1xf32> to vector<8x512xf32>
    %256 = arith.mulf %253, %255 : vector<8x512xf32>
    %257 = arith.addf %248, %256 : vector<8x512xf32>
    %258 = vector.extract_strided_slice %218 {offsets = [0, 4], sizes = [8, 1], strides = [1, 1]} : vector<8x10xf32> to vector<8x1xf32>
    %259 = vector.broadcast %258 : vector<8x1xf32> to vector<8x512xf32>
    %260 = arith.mulf %217, %259 : vector<8x512xf32>
    %261 = arith.addf %257, %260 : vector<8x512xf32>
    %262 = vector.extract_strided_slice %217 {offsets = [0, 16], sizes = [8, 496], strides = [1, 1]} : vector<8x512xf32> to vector<8x496xf32>
    %263 = vector.extract_strided_slice %217 {offsets = [0, 0], sizes = [8, 16], strides = [1, 1]} : vector<8x512xf32> to vector<8x16xf32>
    %264 = tpu.concatenate %262, %263 in 1 : vector<8x496xf32>, vector<8x16xf32> -> vector<8x512xf32>
    %265 = vector.broadcast %33 : vector<1x512xf32> to vector<8x512xf32>
    %266 = arith.mulf %264, %265 : vector<8x512xf32>
    %267 = vector.extract_strided_slice %218 {offsets = [0, 5], sizes = [8, 1], strides = [1, 1]} : vector<8x10xf32> to vector<8x1xf32>
    %268 = vector.broadcast %267 : vector<8x1xf32> to vector<8x512xf32>
    %269 = arith.mulf %266, %268 : vector<8x512xf32>
    %270 = arith.addf %261, %269 : vector<8x512xf32>
    %271 = vector.extract_strided_slice %217 {offsets = [0, 112], sizes = [8, 400], strides = [1, 1]} : vector<8x512xf32> to vector<8x400xf32>
    %272 = vector.extract_strided_slice %217 {offsets = [0, 0], sizes = [8, 112], strides = [1, 1]} : vector<8x512xf32> to vector<8x112xf32>
    %273 = tpu.concatenate %271, %272 in 1 : vector<8x400xf32>, vector<8x112xf32> -> vector<8x512xf32>
    %274 = arith.mulf %19, %26 : vector<1x512xf32>
    %275 = vector.broadcast %274 : vector<1x512xf32> to vector<8x512xf32>
    %276 = arith.mulf %273, %275 : vector<8x512xf32>
    %277 = vector.extract_strided_slice %218 {offsets = [0, 6], sizes = [8, 1], strides = [1, 1]} : vector<8x10xf32> to vector<8x1xf32>
    %278 = vector.broadcast %277 : vector<8x1xf32> to vector<8x512xf32>
    %279 = arith.mulf %276, %278 : vector<8x512xf32>
    %280 = arith.addf %270, %279 : vector<8x512xf32>
    %281 = vector.extract_strided_slice %217 {offsets = [0, 128], sizes = [8, 384], strides = [1, 1]} : vector<8x512xf32> to vector<8x384xf32>
    %282 = vector.extract_strided_slice %217 {offsets = [0, 0], sizes = [8, 128], strides = [1, 1]} : vector<8x512xf32> to vector<8x128xf32>
    %283 = tpu.concatenate %281, %282 in 1 : vector<8x384xf32>, vector<8x128xf32> -> vector<8x512xf32>
    %284 = vector.broadcast %19 : vector<1x512xf32> to vector<8x512xf32>
    %285 = arith.mulf %283, %284 : vector<8x512xf32>
    %286 = vector.extract_strided_slice %218 {offsets = [0, 7], sizes = [8, 1], strides = [1, 1]} : vector<8x10xf32> to vector<8x1xf32>
    %287 = vector.broadcast %286 : vector<8x1xf32> to vector<8x512xf32>
    %288 = arith.mulf %285, %287 : vector<8x512xf32>
    %289 = arith.addf %280, %288 : vector<8x512xf32>
    %290 = vector.extract_strided_slice %217 {offsets = [0, 144], sizes = [8, 368], strides = [1, 1]} : vector<8x512xf32> to vector<8x368xf32>
    %291 = vector.extract_strided_slice %217 {offsets = [0, 0], sizes = [8, 144], strides = [1, 1]} : vector<8x512xf32> to vector<8x144xf32>
    %292 = tpu.concatenate %290, %291 in 1 : vector<8x368xf32>, vector<8x144xf32> -> vector<8x512xf32>
    %293 = arith.mulf %19, %33 : vector<1x512xf32>
    %294 = vector.broadcast %293 : vector<1x512xf32> to vector<8x512xf32>
    %295 = arith.mulf %292, %294 : vector<8x512xf32>
    %296 = vector.extract_strided_slice %218 {offsets = [0, 8], sizes = [8, 1], strides = [1, 1]} : vector<8x10xf32> to vector<8x1xf32>
    %297 = vector.broadcast %296 : vector<8x1xf32> to vector<8x512xf32>
    %298 = arith.mulf %295, %297 : vector<8x512xf32>
    %299 = arith.addf %289, %298 : vector<8x512xf32>
    %300 = vector.extract_strided_slice %218 {offsets = [0, 9], sizes = [8, 1], strides = [1, 1]} : vector<8x10xf32> to vector<8x1xf32>
    %301 = vector.broadcast %300 : vector<8x1xf32> to vector<8x512xf32>
    %302 = arith.addf %299, %301 : vector<8x512xf32>
    %c0_16 = arith.constant 0 : index
    %c0_17 = arith.constant 0 : index
    %303 = vector.load %arg6[%c0_16, %c0_17] : memref<8x9xf32, #tpu.memory_space<vmem>>, vector<8x9xf32>
    %304 = vector.extract_strided_slice %303 {offsets = [0, 0], sizes = [8, 8], strides = [1, 1]} : vector<8x9xf32> to vector<8x8xf32>
    %305 = vector.extract_strided_slice %303 {offsets = [0, 8], sizes = [8, 1], strides = [1, 1]} : vector<8x9xf32> to vector<8x1xf32>
    %cst_18 = arith.constant dense<0.000000e+00> : vector<8x512xf32>
    %306 = tpu.matmul %304, %302, %cst_18 {dimension_numbers = #tpu.dot_dimension_numbers<[1], [0], [0], [1], [0, 0, 1, 1], [], []>} : vector<8x8xf32>, vector<8x512xf32>, vector<8x512xf32> -> vector<8x512xf32>
    %307 = vector.broadcast %305 : vector<8x1xf32> to vector<8x512xf32>
    %308 = arith.addf %306, %307 : vector<8x512xf32>
    %c0_19 = arith.constant 0 : index
    %c0_20 = arith.constant 0 : index
    %c0_21 = arith.constant 0 : index
    %309 = vector.load %arg7[%c0_19, %c0_20, %c0_21] : memref<1x8x512xf32, #tpu.memory_space<vmem>>, vector<1x8x512xf32>
    %310 = vector.shape_cast %309 : vector<1x8x512xf32> to vector<8x512xf32>
    %311 = vector.shape_cast %308 : vector<8x512xf32> to vector<1x8x512xf32>
    tpu.vector_store %arg7[%c0_19, %c0_20, %c0_21], %311 {strides = array<i32>} : memref<1x8x512xf32, #tpu.memory_space<vmem>>, vector<1x8x512xf32>,
    %cst_22 = arith.constant dense<0.000000e+00> : vector<8xf32>
    %312 = vector.multi_reduction <add>, %308, %cst_22 [1] : vector<8x512xf32> to vector<8xf32>
    %313 = vector.shape_cast %312 : vector<8xf32> to vector<8x1xf32>
    %c0_23 = arith.constant 0 : index
    %c0_24 = arith.constant 0 : index
    %c0_25 = arith.constant 0 : index
    %314 = vector.load %arg8[%c0_23, %c0_24, %c0_25] : memref<1x8x1xf32, #tpu.memory_space<vmem>>, vector<1x8x1xf32>
    %315 = vector.shape_cast %314 : vector<1x8x1xf32> to vector<8x1xf32>
    %316 = vector.shape_cast %313 : vector<8x1xf32> to vector<1x8x1xf32>
    tpu.vector_store %arg8[%c0_23, %c0_24, %c0_25], %316 {strides = array<i32>} : memref<1x8x1xf32, #tpu.memory_space<vmem>>, vector<1x8x1xf32>,
    %317 = arith.mulf %308, %308 : vector<8x512xf32>
    %cst_26 = arith.constant dense<0.000000e+00> : vector<8xf32>
    %318 = vector.multi_reduction <add>, %317, %cst_26 [1] : vector<8x512xf32> to vector<8xf32>
    %319 = vector.shape_cast %318 : vector<8xf32> to vector<8x1xf32>
    %c0_27 = arith.constant 0 : index
    %c0_28 = arith.constant 0 : index
    %c0_29 = arith.constant 0 : index
    %320 = vector.load %arg9[%c0_27, %c0_28, %c0_29] : memref<1x8x1xf32, #tpu.memory_space<vmem>>, vector<1x8x1xf32>
    %321 = vector.shape_cast %320 : vector<1x8x1xf32> to vector<8x1xf32>
    %322 = vector.shape_cast %319 : vector<8x1xf32> to vector<1x8x1xf32>
    tpu.vector_store %arg9[%c0_27, %c0_28, %c0_29], %322 {strides = array<i32>} : memref<1x8x1xf32, #tpu.memory_space<vmem>>, vector<1x8x1xf32>,
    return
  }
  func.func @transform_0(%arg0: i32) -> (i32, i32, i32) {
    %c0_i32 = arith.constant 0 : i32
    %c0_i32_0 = arith.constant 0 : i32
    %c0_i32_1 = arith.constant 0 : i32
    return %arg0, %c0_i32, %c0_i32_0 : i32, i32, i32
  }
  func.func @transform_1(%arg0: i32) -> (i32, i32) {
    %c0_i32 = arith.constant 0 : i32
    %c0_i32_0 = arith.constant 0 : i32
    %c0_i32_1 = arith.constant 0 : i32
    return %c0_i32, %c0_i32_0 : i32, i32
  }
  func.func @transform_2(%arg0: i32) -> (i32, i32) {
    %c0_i32 = arith.constant 0 : i32
    %c0_i32_0 = arith.constant 0 : i32
    %c0_i32_1 = arith.constant 0 : i32
    return %c0_i32, %c0_i32_0 : i32, i32
  }
  func.func @transform_3(%arg0: i32) -> (i32, i32) {
    %c0_i32 = arith.constant 0 : i32
    %c0_i32_0 = arith.constant 0 : i32
    %c0_i32_1 = arith.constant 0 : i32
    return %c0_i32, %c0_i32_0 : i32, i32
  }
  func.func @transform_4(%arg0: i32) -> (i32, i32) {
    %c0_i32 = arith.constant 0 : i32
    %c0_i32_0 = arith.constant 0 : i32
    %c0_i32_1 = arith.constant 0 : i32
    return %c0_i32, %c0_i32_0 : i32, i32
  }
  func.func @transform_5(%arg0: i32) -> (i32, i32) {
    %c0_i32 = arith.constant 0 : i32
    %c0_i32_0 = arith.constant 0 : i32
    %c0_i32_1 = arith.constant 0 : i32
    return %c0_i32, %c0_i32_0 : i32, i32
  }
  func.func @transform_6(%arg0: i32) -> (i32, i32, i32) {
    %c0_i32 = arith.constant 0 : i32
    %c0_i32_0 = arith.constant 0 : i32
    %c0_i32_1 = arith.constant 0 : i32
    return %arg0, %c0_i32, %c0_i32_0 : i32, i32, i32
  }
  func.func @transform_7(%arg0: i32) -> (i32, i32, i32) {
    %c0_i32 = arith.constant 0 : i32
    %c0_i32_0 = arith.constant 0 : i32
    %c0_i32_1 = arith.constant 0 : i32
    return %arg0, %c0_i32, %c0_i32_0 : i32, i32, i32
  }
  func.func @transform_8(%arg0: i32) -> (i32, i32, i32) {
    %c0_i32 = arith.constant 0 : i32
    %c0_i32_0 = arith.constant 0 : i32
    %c0_i32_1 = arith.constant 0 : i32
    return %arg0, %c0_i32, %c0_i32_0 : i32, i32, i32
  }
}

module attributes {stable_mosaic.version = 11 : i64} {
  func.func @kernel(%arg0: i32, %arg1: memref<1x8x512xf32, #tpu.memory_space<vmem>>, %arg2: memref<8x1xf32, #tpu.memory_space<vmem>>, %arg3: memref<8x1xf32, #tpu.memory_space<vmem>>, %arg4: memref<1x8x512xf32, #tpu.memory_space<vmem>>) attributes {dimension_semantics = [#tpu.dimension_semantics<parallel>], iteration_bounds = array<i64: 2>, scalar_prefetch = 0 : i64, scratch_operands = 0 : i64, tpu.core_type = #tpu.core_type<tc>, window_params = [{transform_indices = @transform_0, window_bounds = array<i64: 1, 8, 512>}, {pipeline_mode = #tpu.pipeline_mode<synchronous>, transform_indices = @transform_1, window_bounds = array<i64: 8, 1>}, {pipeline_mode = #tpu.pipeline_mode<synchronous>, transform_indices = @transform_2, window_bounds = array<i64: 8, 1>}, {transform_indices = @transform_3, window_bounds = array<i64: 1, 8, 512>}]} {
    %c0 = arith.constant 0 : index
    %c0_0 = arith.constant 0 : index
    %c0_1 = arith.constant 0 : index
    %0 = vector.load %arg1[%c0, %c0_0, %c0_1] : memref<1x8x512xf32, #tpu.memory_space<vmem>>, vector<1x8x512xf32>
    %1 = vector.shape_cast %0 : vector<1x8x512xf32> to vector<8x512xf32>
    %c0_2 = arith.constant 0 : index
    %c0_3 = arith.constant 0 : index
    %2 = vector.load %arg2[%c0_2, %c0_3] : memref<8x1xf32, #tpu.memory_space<vmem>>, vector<8x1xf32>
    %3 = vector.broadcast %2 : vector<8x1xf32> to vector<8x512xf32>
    %4 = arith.mulf %1, %3 : vector<8x512xf32>
    %c0_4 = arith.constant 0 : index
    %c0_5 = arith.constant 0 : index
    %5 = vector.load %arg3[%c0_4, %c0_5] : memref<8x1xf32, #tpu.memory_space<vmem>>, vector<8x1xf32>
    %6 = vector.broadcast %5 : vector<8x1xf32> to vector<8x512xf32>
    %7 = arith.addf %4, %6 : vector<8x512xf32>
    %cst = arith.constant 0.000000e+00 : f32
    %8 = vector.broadcast %cst : f32 to vector<8x512xf32>
    %9 = arith.maximumf %7, %8 : vector<8x512xf32>
    %c0_6 = arith.constant 0 : index
    %c0_7 = arith.constant 0 : index
    %c0_8 = arith.constant 0 : index
    %10 = vector.load %arg4[%c0_6, %c0_7, %c0_8] : memref<1x8x512xf32, #tpu.memory_space<vmem>>, vector<1x8x512xf32>
    %11 = vector.shape_cast %10 : vector<1x8x512xf32> to vector<8x512xf32>
    %12 = vector.shape_cast %9 : vector<8x512xf32> to vector<1x8x512xf32>
    tpu.vector_store %arg4[%c0_6, %c0_7, %c0_8], %12 {strides = array<i32>} : memref<1x8x512xf32, #tpu.memory_space<vmem>>, vector<1x8x512xf32>,
    return
  }
  func.func @transform_0(%arg0: i32) -> (i32, i32, i32) {
    %c0_i32 = arith.constant 0 : i32
    %c0_i32_0 = arith.constant 0 : i32
    %c0_i32_1 = arith.constant 0 : i32
    return %arg0, %c0_i32, %c0_i32_0 : i32, i32, i32
  }
  func.func @transform_1(%arg0: i32) -> (i32, i32) {
    %c0_i32 = arith.constant 0 : i32
    %c0_i32_0 = arith.constant 0 : i32
    %c0_i32_1 = arith.constant 0 : i32
    return %c0_i32, %c0_i32_0 : i32, i32
  }
  func.func @transform_2(%arg0: i32) -> (i32, i32) {
    %c0_i32 = arith.constant 0 : i32
    %c0_i32_0 = arith.constant 0 : i32
    %c0_i32_1 = arith.constant 0 : i32
    return %c0_i32, %c0_i32_0 : i32, i32
  }
  func.func @transform_3(%arg0: i32) -> (i32, i32, i32) {
    %c0_i32 = arith.constant 0 : i32
    %c0_i32_0 = arith.constant 0 : i32
    %c0_i32_1 = arith.constant 0 : i32
    return %arg0, %c0_i32, %c0_i32_0 : i32, i32, i32
  }
}

</mosaic_0001>

<bundles_post_ra>
// kernel: _lambda_.3
= control target key start
LH: loop header
LB: loop body
LE: loop exit
PB: predicated region body
PF: predicated region fallthrough
CT: control target
= control target key end

     0   :  { %s310_s12 = smov 0   ;;  %s333_s0 = inlined_call_operand.vmem [shape: f32[2,8,512], index: 0, kind: input, shape index: {}]   ;;  %s334_s1 = inlined_call_operand.vmem [shape: f32[8,1], index: 1, kind: input, shape index: {}]   ;;  %s335_s2 = inlined_call_operand.vmem [shape: f32[8,1], index: 2, kind: input, shape index: {}]   ;;  %s336_s3 = inlined_call_operand.vmem [shape: f32[2,8,512], index: 3, kind: output, shape index: {}]  }
   0x1 LB: > { %s258_s13 = sadd.s32 4294967295, %s287_s12   ;;  %p262_p0 = scmp.ge.s32.totalorder %s287_s12, 1  ;;  %s287_s12 = sphi %s310_s12, %s13_s12  }
   0x2   : > { %p137_p1 = scmp.lt.s32.totalorder %s287_s12, 3 }
   0x4   : > { %p138_p2 = pnand %p262_p0, %p137_p1 }
   0x5   : > { %p161_p3 = scmp.lt.s32.totalorder (!%p138_p2), %s258_s13, 1 }
   0x6   : > { %141 = sbr.rel (%p138_p2) target bundleno = 144 (0x90), region = 32 }
   0xb   : > { %v175_v0 = vld [vmem:[%s334_s1] sm:$0xff]  ;;  %v289_v1 = vmov 0   ;;  %s338_s13 = smov (!%p161_p3, %s258_s13), 1 }
   0xc   : > { %280 = vset.pattern.permute.xlu0 %v289_v1  ;;  %v185_v2 = vld [vmem:[%s335_s2] sm:$0xff]  ;;  %s269_s18 = sshll.u32 %s338_s13, 5 }
   0xd   : > { %178 = vperm.xlu0 %280, %v175_v0   ;;  %s165_s21 = scalar_lea.vmem %s333_s0, %s269_s18  ;;  %s170_s24 = scalar_lea.vmem %s336_s3, %s269_s18 }
   0xe   : > { %v171_v4 = vld [vmem:[%s165_s21] sm:$0xff]  ;;  %v172_v5 = vld [vmem:[%s165_s21 + $0x8] sm:$0xff]  ;;  %v173_v6 = vld [vmem:[%s165_s21 + $0x10] sm:$0xff] }
   0xf   : > { %v174_v7 = vld [vmem:[%s165_s21 + $0x18] sm:$0xff] }
  0x15   : > { %188 = vperm.xlu0 %280, %v185_v2  }
  0x7f   : > { %v179_v3 = vpop.permute.xlu0 %178 }
  0x80   : > { %v181_v8 = vmul.f32 %v179_v3, %v171_v4  ;;  %v182_v9 = vmul.f32 %v179_v3, %v172_v5  ;;  %v183_v10 = vmul.f32 %v179_v3, %v173_v6  ;;  %v184_v11 = vmul.f32 %v179_v3, %v174_v7 }
  0x87   : > { %v189_v12 = vpop.permute.xlu0 %188 }
  0x88   : > { %v191_v13 = vadd.f32 %v189_v12, %v181_v8  ;;  %v192_v14 = vadd.f32 %v189_v12, %v182_v9  ;;  %v193_v15 = vadd.f32 %v189_v12, %v183_v10  ;;  %v194_v16 = vadd.f32 %v189_v12, %v184_v11 }
  0x8a   : > { %v195_v17 = vmax.f32 %v191_v13, 0.0  ;;  %v196_v18 = vmax.f32 %v192_v14, 0.0  ;;  %v197_v19 = vmax.f32 %v193_v15, 0.0  ;;  %v198_v20 = vmax.f32 %v194_v16, 0.0 }
  0x8c   : > { %199 = vst [vmem:[%s170_s24] sm:$0xff] %v195_v17 }
  0x8d   : > { %200 = vst [vmem:[%s170_s24 + $0x8] sm:$0xff] %v196_v18 }
  0x8e   : > { %201 = vst [vmem:[%s170_s24 + $0x10] sm:$0xff] %v197_v19 }
  0x8f   : > { %202 = vst [vmem:[%s170_s24 + $0x18] sm:$0xff] %v198_v20 }
  0x90 PF: > { %s13_s12 = sadd.s32 1, %s287_s12  }
  0x91   : > { %p10_p4 = scmp.ge.s32.totalorder %s13_s12, 4  }
  0x93   :  { %12 = sbr.rel (!%p10_p4) target bundleno = 1 (0x1), region = 62 }

// kernel: _lambda_.2
= control target key start
LH: loop header
LB: loop body
LE: loop exit
PB: predicated region body
PF: predicated region fallthrough
CT: control target
= control target key end

     0   :  { %s1758_s27 = smov 0   ;;  %s2577_s0 = inlined_call_operand.vmem [shape: f32[2,8,512], index: 0, kind: input, shape index: {}]   ;;  %s2578_s1 = inlined_call_operand.vmem [shape: s32[3,512], index: 1, kind: input, shape index: {}]   ;;  %s2579_s2 = inlined_call_operand.vmem [shape: f32[8,10], index: 2, kind: input, shape index: {}]   ;;  %s2580_s3 = inlined_call_operand.vmem [shape: f32[8,10], index: 3, kind: input, shape index: {}]   ;;  %s2581_s4 = inlined_call_operand.vmem [shape: f32[8,10], index: 4, kind: input, shape index: {}]   ;;  %s2582_s5 = inlined_call_operand.vmem [shape: f32[8,9], index: 5, kind: input, shape index: {}]   ;;  %s2583_s6 = inlined_call_operand.vmem [shape: f32[2,8,512], index: 6, kind: output, shape index: {0}]   ;;  %s2584_s7 = inlined_call_operand.vmem [shape: f32[2,8,1], index: 7, kind: output, shape index: {1}]   ;;  %s2585_s8 = inlined_call_operand.vmem [shape: f32[2,8,1], index: 8, kind: output, shape index: {2}]  }
   0x1 LB: > { %s1597_s28 = sadd.s32 4294967295, %s1692_s27   ;;  %p1601_p0 = scmp.ge.s32.totalorder %s1692_s27, 1  ;;  %s1692_s27 = sphi %s1758_s27, %s19_s27  }
   0x2   : > { %p267_p1 = scmp.lt.s32.totalorder %s1692_s27, 3 }
   0x4   : > { %p268_p2 = pnand %p1601_p0, %p267_p1 }
   0x6   : > { %271 = sbr.rel (%p268_p2) target bundleno = 840 (0x348), region = 44 }
   0xb   : > { %p309_p3 = scmp.lt.s32.totalorder %s1597_s28, 1  ;;  %v2597_v0 = vmov 1   ;;  %v2586_v1 = vmov 0   ;;  %s1696_s11 = smov 17   ;;  %v2589_v6 = vmov 3   ;;  %v385_v7 = vld [vmem:[%s2579_s2] sm:$0xff] }
   0xc   : > { %1656 = vset.pattern.permute.xlu1 %v2597_v0  ;;  %1655 = vset.pattern.permute.xlu0 %v2586_v1  ;;  %s1697_s12 = smov 16   ;;  %s1698_s13 = smov 15   ;;  %v2594_v8 = vmov 2   ;;  %v2600_v9 = vmov 5   ;;  %v2602_v10 = vmov 4   ;;  %v2587_v11 = vmov 8  }
   0xd   : > { %s2689_s28 = smov (!%p309_p3, %s1597_s28), 1  ;;  %1658 = vset.pattern.permute.xlu2 %v2589_v6  ;;  %s1700_s16 = smov 1   ;;  %v2595_v12 = vmov 6   ;;  %v2598_v13 = vmov 7   ;;  %vm458_vm0 = vcmask 130048   ;;  %v2590_v18 = vmov 9  }
   0xe   : > { %s1626_s29 = sshll.u32 %s2689_s28, 5  ;;  %s1703_s17 = smov 127   ;;  %v1852_v19 = vld [vmem:[%s2578_s1 + $0x8] sm:$0x77]  ;;  %v1857_v20 = vld [vmem:[%s2578_s1] sm:$0x77] }
   0xf   : > { %s313_s10 = scalar_lea.vmem %s2577_s0, %s1626_s29  ;;  %s1705_s18 = smov 113   ;;  %vm506_vm1 = vcmask 121856   ;;  %vm334_vm2 = vcmp.ge.s32.totalorder %v1852_v19, 1  ;;  %vm370_vm3 = vcmp.le.s32.totalorder %v1852_v19, 16  ;;  %vm333_vm4 = vcmp.ge.s32.totalorder %v1857_v20, 1 }
  0x10   : > { %v1776_v2 = vld [vmem:[%s313_s10 + $0x18] sm:$0xff]  ;;  %v1778_v3 = vld [vmem:[%s313_s10 + $0x8] sm:$0xff]  ;;  %v1784_v4 = vld [vmem:[%s313_s10 + $0x10] sm:$0xff]  ;;  %s1707_s19 = smov 112   ;;  %s1710_s20 = smov 111   ;;  %vm369_vm5 = vcmp.le.s32.totalorder %v1857_v20, 16 }
  0x11   : > { %387 = vrot.lane.b32.xlu0 %v1776_v2, %s1696_s11  ;;  %395 = vrot.lane.b32.xlu1 %v1778_v3, %s1696_s11  ;;  %v1786_v5 = vld [vmem:[%s313_s10] sm:$0xff]  ;;  %vm372_vm6 = vmand %vm334_vm2, %vm370_vm3  ;;  %vm399_vm8 = vcmask 138240   ;;  %v2592_v25 = vmov 0.0   ;;  %vm354_vm9 = vcmp.le.s32.totalorder %v1852_v19, 8  ;;  %vm353_vm10 = vcmp.le.s32.totalorder %v1857_v20, 8  ;;  %s318_s14 = scalar_lea.vmem %s2583_s6, %s1626_s29  ;;  %s1606_s29 = sshll.u32 %s2689_s28, 3 }
  0x12   : > { %449 = vrot.lane.b32.xlu2 %v1776_v2, %s1697_s12  ;;  %vm371_vm7 = vmand %vm333_vm4, %vm369_vm5  ;;  %v1873_v26 = vsel %vm372_vm6, 1.0, %v2592_v25  ;;  %vm344_vm12 = vcmp.ge.s32.totalorder %v1852_v19, 4294967295  ;;  %vm378_vm13 = vcmp.le.s32.totalorder %v1852_v19, 14  ;;  %vm343_vm3 = vcmp.ge.s32.totalorder %v1857_v20, 4294967295 }
  0x13   : > { %v1878_v28 = vsel %vm371_vm7, 1.0, %v2592_v25  ;;  %v412_v34 = vrot.slane %v1873_v26, 5  ;;  %vm356_vm11 = vmand %vm334_vm2, %vm354_vm9  ;;  %vm377_vm5 = vcmp.le.s32.totalorder %v1857_v20, 14  ;;  %vm564_vm7 = vcmask 7168  }
  0x14   : > { %v410_v35 = vrot.slane %v1878_v28, 5  ;;  %vm355_vm14 = vmand %vm333_vm4, %vm353_vm10  ;;  %v1892_v37 = vsel %vm356_vm11, 1.0, %v2592_v25  ;;  %vm621_vm11 = vcmask 1039360  }
  0x15   : > { %v1887_v36 = vrot.slane %v412_v34, 4  ;;  %2630 = vst [vmem:[#allocation2_spill] sm:$0xff] %v1892_v37  ;;  %vm380_vm15 = vmand %vm344_vm12, %vm378_vm13  ;;  %v1907_v45 = vsel %vm355_vm14, 1.0, %v2592_v25  ;;  %v472_v51 = vperm.slane %v1892_v37, 5  ;;  %v471_v53 = vperm.slane %v1892_v37, 1 }
  0x16   : > { %v1896_v39 = vrot.slane %v410_v35, 4  ;;  %2631 = vst [vmem:[#allocation3_spill] sm:$0xff] %v1907_v45  ;;  %v1910_v46 = vsel %vm380_vm15, 1.0, %v2592_v25  ;;  %vm379_vm6 = vmand %vm343_vm3, %vm377_vm5  ;;  %v469_v48 = vperm.slane %v1907_v45, 1  ;;  %v470_v52 = vperm.slane %v1907_v45, 5 }
  0x17   : > { %v417_v44 = vmul.f32 %v1892_v37, %v1887_v36  ;;  %v519_v50 = vrot.slane %v1910_v46, 5  ;;  %v1922_v58 = vsel %vm379_vm6, 1.0, %v2592_v25  ;;  %vm667_vm13 = vcmask 924672  }
  0x18   : > { %v416_v47 = vmul.f32 %v1907_v45, %v1896_v39  ;;  %v1927_v62 = vperm.slane %v469_v48, 1  ;;  %vm717_vm14 = vcmask 916480   ;;  %vm765_vm15 = vcmask 908288  }
  0x19   : > { %397 = vrot.lane.b32.xlu1 %v1784_v4, %s1696_s11  ;;  %393 = vrot.lane.b32.xlu0 %v1786_v5, %s1696_s11  ;;  %v422_v49 = vperm.slane %v417_v44, 1  ;;  %v423_v54 = vperm.slane %v417_v44, 5  ;;  %vm335_vm5 = vcmp.le.s32.totalorder %v1857_v20, 4  ;;  %vm345_vm6 = vcmp.le.s32.totalorder %v1857_v20, 2 }
  0x1a   : > { %452 = vrot.lane.b32.xlu2 %v1786_v5, %s1697_s12  ;;  %v420_v55 = vperm.slane %v416_v47, 1  ;;  %v421_v56 = vperm.slane %v416_v47, 5  ;;  %2632 = vst [vmem:[#allocation4_spill] sm:$0xff] %v1927_v62 }
  0x1b   : > { %v430_v63 = vperm.slane %v422_v49, 1 }
  0x1c   : > { %v429_v34 = vperm.slane %v421_v56, 1 }
  0x21   : > { %456 = vrot.lane.b32.xlu1 %v1784_v4, %s1697_s12  ;;  %454 = vrot.lane.b32.xlu0 %v1778_v3, %s1697_s12 }
  0x22   : > { %497 = vrot.lane.b32.xlu2 %v1776_v2, %s1698_s13 }
  0x29   : > { %502 = vrot.lane.b32.xlu1 %v1778_v3, %s1698_s13  ;;  %500 = vrot.lane.b32.xlu0 %v1786_v5, %s1698_s13 }
  0x2a   : > { %504 = vrot.lane.b32.xlu2 %v1784_v4, %s1698_s13 }
  0x31   : > { %486 = vperm.xlu1 %1656, %v385_v7   ;;  %438 = vperm.xlu0 %1655, %v385_v7  }
  0x32   : > { %555 = vrot.lane.b32.xlu2 %v1776_v2, %s1700_s16 }
  0x39   : > { %558 = vrot.lane.b32.xlu1 %v1786_v5, %s1700_s16  ;;  %562 = vrot.lane.b32.xlu0 %v1784_v4, %s1700_s16 }
  0x3a   : > { %1657 = vset.pattern.permute.xlu1 %v2594_v8  ;;  %560 = vrot.lane.b32.xlu2 %v1778_v3, %s1700_s16 }
  0x3b   : > { %1660 = vset.pattern.permute.xlu0 %v2600_v9 }
  0x41   : > { %544 = vperm.xlu1 %1657, %v385_v7   ;;  %613 = vrot.lane.b32.xlu0 %v1786_v5, %s1703_s17 }
  0x42   : > { %590 = vperm.xlu2 %1658, %v385_v7  }
  0x49   : > { %615 = vrot.lane.b32.xlu1 %v1778_v3, %s1703_s17  ;;  %619 = vrot.lane.b32.xlu0 %v1776_v2, %s1703_s17 }
  0x4a   : > { %1659 = vset.pattern.permute.xlu1 %v2602_v10  ;;  %617 = vrot.lane.b32.xlu2 %v1784_v4, %s1703_s17 }
  0x4b   : > { %1664 = vset.pattern.permute.xlu2 %v2590_v18 }
  0x51   : > { %602 = vperm.xlu1 %1659, %v385_v7   ;;  %661 = vrot.lane.b32.xlu0 %v1778_v3, %s1705_s18 }
  0x52   : > { %659 = vrot.lane.b32.xlu2 %v1786_v5, %s1705_s18 }
  0x59   : > { %663 = vrot.lane.b32.xlu1 %v1784_v4, %s1705_s18  ;;  %648 = vperm.xlu0 %1660, %v385_v7  }
  0x5a   : > { %665 = vrot.lane.b32.xlu2 %v1776_v2, %s1705_s18  ;;  %1663 = vset.pattern.permute.xlu1 %v2587_v11 }
  0x61   : > { %709 = vrot.lane.b32.xlu1 %v1786_v5, %s1707_s19  ;;  %1661 = vset.pattern.permute.xlu0 %v2595_v12 }
  0x62   : > { %698 = vperm.xlu0 %1661, %v385_v7   ;;  %711 = vrot.lane.b32.xlu2 %v1778_v3, %s1707_s19 }
  0x69   : > { %713 = vrot.lane.b32.xlu1 %v1784_v4, %s1707_s19 }
  0x6a   : > { %1662 = vset.pattern.permute.xlu0 %v2598_v13  ;;  %715 = vrot.lane.b32.xlu2 %v1776_v2, %s1707_s19 }
  0x6b   : > { %746 = vperm.xlu0 %1662, %v385_v7  }
  0x6c   : > { %v450_v14 = vpop.permute.xlu2 %449 }
  0x71   : > { %757 = vrot.lane.b32.xlu1 %v1786_v5, %s1710_s20 }
  0x72   : > { %759 = vrot.lane.b32.xlu2 %v1778_v3, %s1710_s20 }
  0x73   : > { %1666 = vset.pattern.permute.xlu0 %v2597_v0 }
  0x74   : > { %v453_v15 = vpop.permute.xlu2 %452 }
  0x75   : > { %v1842_v16 = vsel %vm458_vm0, %v450_v14, %v453_v15 }
  0x76   : > { %v481_v35 = vmul.f32 %v1927_v62, %v1842_v16 }
  0x79   : > { %761 = vrot.lane.b32.xlu1 %v1784_v4, %s1710_s20 }
  0x7a   : > { %763 = vrot.lane.b32.xlu2 %v1776_v2, %s1710_s20  ;;  %s326_s20 = scalar_lea.vmem %s2585_s8, %s1606_s29 }
  0x7c   : > { %v1846_v17 = vpop.permute.xlu2 %497 }
  0x81   : > { %796 = vperm.xlu1 %1663, %v385_v7  }
  0x82   : > { %808 = vperm.xlu2 %1664, %v385_v7   ;;  %v1929_v7 = vrot.slane %v519_v50, 4 }
  0x83   : > { %v388_v21 = vpop.permute.xlu0 %387  ;;  %v396_v22 = vpop.permute.xlu1 %395 }
  0x84   : > { %v505_v23 = vpop.permute.xlu2 %504  ;;  %v524_v44 = vmul.f32 %v1892_v37, %v1929_v7 }
  0x85   : > { %v1865_v24 = vsel %vm506_vm1, %v505_v23, %v1846_v17 }
  0x89   : > { %1668 = vset.pattern.permute.xlu1 %v2589_v6 }
  0x8a   : > { %1665 = vset.pattern.permute.xlu2 %v2586_v1 }
  0x8b   : > { %v398_v27 = vpop.permute.xlu1 %397  ;;  %v394_v29 = vpop.permute.xlu0 %393 }
  0x8c   : > { %v401_v30 = vsel %vm399_vm8, %v396_v22, %v398_v27  ;;  %v402_v31 = vsel %vm399_vm8, %v398_v27, %v388_v21  ;;  %v400_v32 = vsel %vm399_vm8, %v394_v29, %v396_v22  ;;  %v407_v33 = vsel %vm399_vm8, %v388_v21, %v394_v29  ;;  %v1894_v38 = vpop.permute.xlu2 %555 }
  0x8d   : > { %v1935_v21 = vperm.slane %v471_v53, 1  ;;  %v517_v22 = vrot.slane %v1922_v58, 5  ;;  %v431_v27 = vperm.slane %v423_v54, 1  ;;  %v428_v29 = vperm.slane %v420_v55, 1 }
  0x8e   : > { %v433_v54 = vmul.f32 %v429_v34, %v400_v32  ;;  %v530_v32 = vperm.slane %v524_v44, 5  ;;  %vm361_vm8 = vcmp.le.s32.totalorder %v1857_v20, 6 }
  0x8f   : > { %2635 = vst [vmem:[#allocation7_spill] sm:$0xff] %v1935_v21  ;;  %v1946_v50 = vrot.slane %v517_v22, 4  ;;  %v432_v53 = vmul.f32 %v428_v29, %v407_v33  ;;  %v574_v29 = vperm.slane %v1878_v28, 6  ;;  %vm363_vm10 = vmand %vm343_vm3, %vm361_vm8 }
  0x90   : > { %vm337_vm8 = vmand %vm333_vm4, %vm335_vm5 }
  0x93   : > { %v457_v40 = vpop.permute.xlu1 %456  ;;  %v455_v41 = vpop.permute.xlu0 %454 }
  0x94   : > { %v461_v42 = vsel %vm458_vm0, %v457_v40, %v450_v14  ;;  %v459_v43 = vsel %vm458_vm0, %v453_v15, %v455_v41  ;;  %v1925_v61 = vpop.permute.xlu2 %560  ;;  %v1931_v14 = vperm.slane %v472_v51, 1  ;;  %v1933_v15 = vperm.slane %v470_v52, 1 }
  0x95   : > { %v434_v51 = vmul.f32 %v430_v63, %v401_v30  ;;  %v435_v52 = vmul.f32 %v431_v27, %v402_v31  ;;  %v529_v63 = vperm.slane %v524_v44, 1  ;;  %v573_v27 = vperm.slane %v1878_v28, 2 }
  0x96   : > { %2633 = vst [vmem:[#allocation5_spill] sm:$0xff] %v1931_v14  ;;  %v484_v47 = vmul.f32 %v1931_v14, %v461_v42  ;;  %v482_v48 = vmul.f32 %v1933_v15, %v459_v43  ;;  %v523_v43 = vmul.f32 %v1907_v45, %v1946_v50 }
  0x97   : > { %2634 = vst [vmem:[#allocation6_spill] sm:$0xff] %v1933_v15 }
  0x98   : > { %v527_v34 = vperm.slane %v523_v43, 1 }
  0x9b   : > { %v503_v57 = vpop.permute.xlu1 %502  ;;  %v501_v59 = vpop.permute.xlu0 %500 }
  0x9c   : > { %v508_v60 = vsel %vm506_vm1, %v503_v57, %v505_v23  ;;  %v460_v23 = vsel %vm458_vm0, %v455_v41, %v457_v40  ;;  %v507_v44 = vsel %vm506_vm1, %v501_v59, %v503_v57 }
  0x9d   : > { %v483_v49 = vmul.f32 %v1935_v21, %v460_v23  ;;  %v1950_v23 = vpop.permute.xlu2 %590 }
  0xa3   : > { %v487_v55 = vpop.permute.xlu1 %486  ;;  %v439_v40 = vpop.permute.xlu0 %438 }
  0xa4   : > { %v489_v41 = vmul.f32 %v487_v55, %v481_v35  ;;  %v490_v56 = vmul.f32 %v487_v55, %v482_v48  ;;  %v491_v16 = vmul.f32 %v487_v55, %v483_v49  ;;  %v492_v1 = vmul.f32 %v487_v55, %v484_v47 }
  0xa5   : > { %v441_v11 = vmul.f32 %v439_v40, %v432_v53  ;;  %v442_v6 = vmul.f32 %v439_v40, %v433_v54  ;;  %v443_v18 = vmul.f32 %v439_v40, %v434_v51  ;;  %v444_v42 = vmul.f32 %v439_v40, %v435_v52  ;;  %v1965_v55 = vpop.permute.xlu2 %617 }
  0xa6   : > { %v528_v35 = vperm.slane %v523_v43, 5  ;;  %v538_v48 = vperm.slane %v530_v32, 1  ;;  %v537_v49 = vperm.slane %v529_v63, 1  ;;  %v1954_v51 = vperm.slane %v573_v27, 2 }
  0xa7   : > { %v493_v22 = vadd.f32 %v489_v41, %v441_v11  ;;  %v494_v30 = vadd.f32 %v490_v56, %v442_v6  ;;  %v495_v31 = vadd.f32 %v491_v16, %v443_v18  ;;  %v496_v33 = vadd.f32 %v492_v1, %v444_v42 }
  0xa8   : > { %v1956_v52 = vperm.slane %v574_v29, 2  ;;  %v535_v11 = vperm.slane %v527_v34, 1  ;;  %v536_v6 = vperm.slane %v528_v35, 1  ;;  %v514_v53 = vsel %vm506_vm1, %v1846_v17, %v501_v59 }
  0xa9   : > { %v542_v56 = vmul.f32 %v538_v48, %v1865_v24  ;;  %v541_v16 = vmul.f32 %v537_v49, %v508_v60  ;;  %vm362_vm1 = vcmp.le.s32.totalorder %v1852_v19, 6 }
  0xaa   : > { %v539_v42 = vmul.f32 %v535_v11, %v514_v53  ;;  %v540_v43 = vmul.f32 %v536_v6, %v507_v44  ;;  %vm364_vm9 = vmand %vm344_vm12, %vm362_vm1  ;;  %vm346_vm1 = vcmp.le.s32.totalorder %v1852_v19, 2 }
  0xab   : > { %v559_v47 = vpop.permute.xlu1 %558  ;;  %v563_v54 = vpop.permute.xlu0 %562 }
  0xac   : > { %v565_v1 = vsel %vm564_vm7, %v559_v47, %v1925_v61  ;;  %v572_v18 = vsel %vm564_vm7, %v1894_v38, %v559_v47 }
  0xad   : > { %v585_v40 = vmul.f32 %v1954_v51, %v572_v18  ;;  %v586_v41 = vmul.f32 %v1956_v52, %v565_v1  ;;  %v1982_v48 = vpop.permute.xlu2 %659 }
  0xaf   : > { %v593_v34 = vmul.f32 %v1950_v23, %v585_v40  ;;  %v594_v17 = vmul.f32 %v1950_v23, %v586_v41  ;;  %v575_v40 = vperm.slane %v1873_v26, 2  ;;  %v2012_v41 = vsel %vm364_vm9, 1.0, %v2592_v25 }
  0xb0   : > { %2636 = vst [vmem:[#allocation8_spill] sm:$0xff] %v2012_v41  ;;  %vm336_vm9 = vcmp.le.s32.totalorder %v1852_v19, 4  ;;  %v925_v19 = vrot.slane %v1910_v46, 6 }
  0xb3   : > { %v545_v32 = vpop.permute.xlu1 %544  ;;  %v1980_v60 = vpop.permute.xlu0 %613 }
  0xb4   : > { %v547_v63 = vmul.f32 %v545_v32, %v539_v42  ;;  %v548_v27 = vmul.f32 %v545_v32, %v540_v43  ;;  %v549_v29 = vmul.f32 %v545_v32, %v541_v16  ;;  %v550_v57 = vmul.f32 %v545_v32, %v542_v56 }
  0xb5   : > { %v1988_v44 = vpop.permute.xlu2 %665  ;;  %v2015_v56 = vsel %vm363_vm10, 1.0, %v2592_v25  ;;  %v576_v16 = vperm.slane %v1873_v26, 6  ;;  %v678_v42 = vmul.f32 %v2012_v41, %v1887_v36  ;;  %v567_v36 = vsel %vm564_vm7, %v563_v54, %v1894_v38  ;;  %vm347_vm10 = vmand %vm343_vm3, %vm345_vm6 }
  0xb6   : > { %v551_v59 = vadd.f32 %v547_v63, %v493_v22  ;;  %v552_v35 = vadd.f32 %v548_v27, %v494_v30  ;;  %v1972_v47 = vadd.f32 %v549_v29, %v495_v31  ;;  %v1974_v18 = vadd.f32 %v550_v57, %v496_v33  ;;  %v1998_v31 = vld [vmem:[%s2580_s3] sm:$0xff]  ;;  %2637 = vst [vmem:[#allocation9_spill] sm:$0xff] %v2015_v56 }
  0xb7   : > { %865 = vperm.xlu2 %1665, %v1998_v31   ;;  %v677_v43 = vmul.f32 %v2015_v56, %v1896_v39  ;;  %v2025_v63 = vperm.slane %v575_v40, 2  ;;  %v2029_v29 = vperm.slane %v576_v16, 2  ;;  %v566_v57 = vsel %vm564_vm7, %v1925_v61, %v563_v54 }
  0xb8   : > { %v1976_v1 = vadd.f32 %v593_v34, %v551_v59  ;;  %v1978_v24 = vadd.f32 %v594_v17, %v552_v35  ;;  %v631_v34 = vperm.slane %v1922_v58, 2  ;;  %v632_v17 = vperm.slane %v1922_v58, 6 }
  0xb9   : > { %2638 = vst [vmem:[#allocation10_spill] sm:$0xff] %v2029_v29  ;;  %v633_v39 = vperm.slane %v1910_v46, 2  ;;  %v634_v59 = vperm.slane %v1910_v46, 6  ;;  %v684_v35 = vperm.slane %v678_v42, 5  ;;  %v681_v40 = vperm.slane %v677_v43, 1 }
  0xba   : > { %v682_v25 = vperm.slane %v677_v43, 5  ;;  %v587_v12 = vmul.f32 %v2025_v63, %v566_v57  ;;  %v588_v61 = vmul.f32 %v2029_v29, %v567_v36  ;;  %v2043_v0 = vperm.slane %v631_v34, 2 }
  0xbb   : > { %v616_v49 = vpop.permute.xlu1 %615  ;;  %v1984_v11 = vpop.permute.xlu0 %619  ;;  %v2045_v13 = vperm.slane %v632_v17, 2  ;;  %v2047_v38 = vperm.slane %v633_v39, 2  ;;  %v2049_v54 = vperm.slane %v634_v59, 2  ;;  %v729_v9 = vperm.slane %v2015_v56, 1 }
  0xbc   : > { %v692_v43 = vperm.slane %v684_v35, 1  ;;  %v689_v10 = vperm.slane %v681_v40, 1  ;;  %v2053_v15 = vperm.slane %v682_v25, 1  ;;  %v595_v36 = vmul.f32 %v1950_v23, %v587_v12 }
  0xbd   : > { %v2001_v33 = vpop.permute.xlu2 %711  ;;  %v676_v34 = vsel %vm667_vm13, %v1988_v44, %v1982_v48  ;;  %v2061_v17 = vmul.f32 %v2015_v56, %v1946_v50  ;;  %v776_v39 = vmul.f32 %v2012_v41, %v1929_v7  ;;  %v596_v59 = vmul.f32 %v1950_v23, %v588_v61 }
  0xbe   : > { %v731_v12 = vperm.slane %v2012_v41, 1  ;;  %v622_v25 = vsel %vm621_vm11, %v1980_v60, %v616_v49  ;;  %v623_v40 = vsel %vm621_vm11, %v616_v49, %v1965_v55  ;;  %v2074_v50 = vperm.slane %v729_v9, 1 }
  0xbf   : > { %1667 = vset.pattern.permute.xlu2 %v2594_v8  ;;  %v683_v8 = vperm.slane %v678_v42, 1  ;;  %v732_v42 = vperm.slane %v2012_v41, 5  ;;  %v624_v23 = vsel %vm621_vm11, %v1965_v55, %v1984_v11  ;;  %v630_v61 = vsel %vm621_vm11, %v1984_v11, %v1980_v60 }
  0xc0   : > { %2639 = vst [vmem:[#allocation11_spill] sm:$0xff] %v2074_v50  ;;  %v599_v62 = vadd.f32 %v595_v36, %v1972_v47  ;;  %v696_v14 = vmul.f32 %v692_v43, %v676_v34  ;;  %v600_v49 = vadd.f32 %v596_v59, %v1974_v18  ;;  %v782_v41 = vperm.slane %v776_v39, 5 }
  0xc1   : > { %v691_v57 = vperm.slane %v683_v8, 1  ;;  %v730_v8 = vperm.slane %v2015_v56, 5  ;;  %v2076_v21 = vperm.slane %v732_v42, 1  ;;  %v779_v42 = vperm.slane %v2061_v17, 1 }
  0xc2   : > { %v643_v56 = vmul.f32 %v2043_v0, %v622_v25  ;;  %v644_v55 = vmul.f32 %v2045_v13, %v623_v40  ;;  %v2095_v29 = vperm.slane %v731_v12, 1  ;;  %v645_v47 = vmul.f32 %v2047_v38, %v624_v23 }
  0xc3   : > { %v1986_v6 = vpop.permute.xlu1 %602  ;;  %v1993_v30 = vpop.permute.xlu0 %661  ;;  %2640 = vst [vmem:[#allocation12_spill] sm:$0xff] %v2076_v21  ;;  %v2093_v37 = vperm.slane %v730_v8, 1  ;;  %v646_v60 = vmul.f32 %v2049_v54, %v630_v61  ;;  %v781_v36 = vperm.slane %v776_v39, 1  ;;  %v787_v59 = vperm.slane %v779_v42, 1 }
  0xc4   : > { %v605_v9 = vmul.f32 %v1986_v6, %v1786_v5  ;;  %2642 = vst [vmem:[#allocation14_spill] sm:$0xff] %v2095_v29  ;;  %v606_v18 = vmul.f32 %v1986_v6, %v1778_v3  ;;  %v607_v5 = vmul.f32 %v1986_v6, %v1784_v4  ;;  %v608_v11 = vmul.f32 %v1986_v6, %v1776_v2 }
  0xc5   : > { %v2027_v27 = vpop.permute.xlu2 %715  ;;  %2641 = vst [vmem:[#allocation13_spill] sm:$0xff] %v2093_v37  ;;  %v668_v43 = vsel %vm667_vm13, %v1982_v48, %v1993_v30  ;;  %v790_v8 = vperm.slane %v782_v41, 1  ;;  %v780_v12 = vperm.slane %v2061_v17, 5  ;;  %v789_v40 = vperm.slane %v781_v36, 1 }
  0xc6   : > { %v609_v34 = vadd.f32 %v605_v9, %v1976_v1  ;;  %v610_v1 = vadd.f32 %v606_v18, %v1978_v24  ;;  %v611_v6 = vadd.f32 %v607_v5, %v599_v62  ;;  %v693_v39 = vmul.f32 %v689_v10, %v668_v43 }
  0xcb   : > { %v1990_v22 = vpop.permute.xlu1 %663  ;;  %v2023_v32 = vpop.permute.xlu0 %648 }
  0xcc   : > { %v670_v3 = vsel %vm667_vm13, %v1990_v22, %v1988_v44  ;;  %v651_v4 = vmul.f32 %v2023_v32, %v643_v56  ;;  %v654_v41 = vmul.f32 %v2023_v32, %v646_v60  ;;  %v612_v44 = vadd.f32 %v608_v11, %v600_v49 }
  0xcd   : > { %v2078_v7 = vpop.permute.xlu2 %759  ;;  %v669_v56 = vsel %vm667_vm13, %v1993_v30, %v1990_v22  ;;  %v695_v61 = vmul.f32 %v691_v57, %v670_v3  ;;  %v653_v9 = vmul.f32 %v2023_v32, %v645_v47  ;;  %v652_v43 = vmul.f32 %v2023_v32, %v644_v55  ;;  %vm348_vm13 = vmand %vm344_vm12, %vm346_vm1 }
  0xce   : > { %v655_v60 = vadd.f32 %v651_v4, %v609_v34  ;;  %v658_v49 = vadd.f32 %v654_v41, %v612_v44  ;;  %v788_v34 = vperm.slane %v780_v12, 1  ;;  %v694_v3 = vmul.f32 %v2053_v15, %v669_v56 }
  0xcf   : > { %v657_v36 = vadd.f32 %v653_v9, %v611_v6  ;;  %v656_v56 = vadd.f32 %v652_v43, %v610_v1  ;;  %v2652_v43 = vmov 2  }
  0xd3   : > { %v2008_v53 = vpop.permute.xlu1 %709 }
  0xd4   : > { %v2066_v35 = vpop.permute.xlu0 %698  ;;  %v718_v2 = vsel %vm717_vm14, %v2008_v53, %v2001_v33  ;;  %v726_v17 = vsel %vm717_vm14, %v2027_v27, %v2008_v53 }
  0xd5   : > { %v741_v62 = vmul.f32 %v2074_v50, %v718_v2  ;;  %v764_v42 = vpop.permute.xlu2 %763  ;;  %v744_v53 = vmul.f32 %v2076_v21, %v726_v17  ;;  %v701_v10 = vmul.f32 %v2066_v35, %v693_v39  ;;  %v703_v22 = vmul.f32 %v2066_v35, %v695_v61 }
  0xd6   : > { %v702_v44 = vmul.f32 %v2066_v35, %v694_v3  ;;  %v837_v3 = vrot.slane %v1878_v28, 6  ;;  %v923_v28 = vrot.slane %v1922_v58, 6 }
  0xd7   : > { %v705_v4 = vadd.f32 %v701_v10, %v655_v60 }
  0xdb   : > { %v2039_v16 = vpop.permute.xlu1 %713 }
  0xdc   : > { %v720_v48 = vsel %vm717_vm14, %v2039_v16, %v2027_v27  ;;  %v704_v27 = vmul.f32 %v2066_v35, %v696_v14  ;;  %v719_v30 = vsel %vm717_vm14, %v2001_v33, %v2039_v16  ;;  %v707_v16 = vadd.f32 %v703_v22, %v657_v36 }
  0xdd   : > { %v747_v25 = vpop.permute.xlu0 %746  ;;  %v743_v24 = vmul.f32 %v2095_v29, %v720_v48  ;;  %v742_v33 = vmul.f32 %v2093_v37, %v719_v30  ;;  %v2645_v22 = vmov 7   ;;  %v2646_v30 = vmov 1  }
  0xde   : > { %v749_v57 = vmul.f32 %v747_v25, %v741_v62  ;;  %v752_v47 = vmul.f32 %v747_v25, %v744_v53  ;;  %v708_v2 = vadd.f32 %v704_v27, %v658_v49  ;;  %v809_v62 = vpop.permute.xlu2 %808  ;;  %v2644_v27 = vmov 5   ;;  %v2182_v49 = vld [vmem:[%s2581_s4] sm:$0xff] }
  0xdf   : > { %v751_v14 = vmul.f32 %v747_v25, %v743_v24  ;;  %v750_v9 = vmul.f32 %v747_v25, %v742_v33 }
  0xe0   : > { %v756_v39 = vadd.f32 %v752_v47, %v708_v2  ;;  %v2648_v47 = vmov 9   ;;  %v2653_v2 = vmov 0.0  }
  0xe1   : > { %v755_v6 = vadd.f32 %v751_v14, %v707_v16  ;;  %v2223_v33 = vsel %vm347_vm10, 1.0, %v2653_v2  ;;  %v2232_v20 = vsel %vm348_vm13, 1.0, %v2653_v2 }
  0xe2   : > { %2654 = vst [vmem:[#allocation15_spill] sm:$0xff] %v2223_v33  ;;  %v1041_v58 = vperm.slane %v2232_v20, 0 }
  0xe3   : > { %v758_v45 = vpop.permute.xlu1 %757  ;;  %2656 = vst [vmem:[#allocation17_spill] sm:$0xff] %v2232_v20 }
  0xe4   : > { %v766_v18 = vsel %vm765_vm15, %v758_v45, %v2078_v7  ;;  %v774_v5 = vsel %vm765_vm15, %v764_v42, %v758_v45  ;;  %v753_v45 = vadd.f32 %v749_v57, %v705_v4  ;;  %v2647_v57 = vmov 6  }
  0xe5   : > { %v791_v48 = vmul.f32 %v787_v59, %v766_v18  ;;  %v794_v41 = vmul.f32 %v790_v8, %v774_v5  ;;  %v2649_v18 = vmov 3   ;;  %v2650_v5 = vmov 8  }
  0xe6   : > { %v2220_v4 = vrot.slane %v837_v3, 4 }
  0xeb   : > { %v762_v23 = vpop.permute.xlu1 %761 }
  0xec   : > { %v768_v11 = vsel %vm765_vm15, %v762_v23, %v764_v42  ;;  %v767_v32 = vsel %vm765_vm15, %v2078_v7, %v762_v23  ;;  %v2643_v23 = vmov 4   ;;  %vm338_vm15 = vmand %vm334_vm2, %vm336_vm9 }
  0xed   : > { %v793_v17 = vmul.f32 %v789_v40, %v768_v11  ;;  %v792_v24 = vmul.f32 %v788_v34, %v767_v32  ;;  %v706_v40 = vadd.f32 %v702_v44, %v656_v56  ;;  %v2651_v11 = vmov 0  }
  0xee   : > { %v1039_v44 = vperm.slane %v2223_v33, 0 }
  0xef   : > { %v754_v7 = vadd.f32 %v750_v9, %v706_v40 }
  0xf3   : > { %v797_v55 = vpop.permute.xlu1 %796 }
  0xf4   : > { %v799_v12 = vmul.f32 %v797_v55, %v791_v48  ;;  %v801_v61 = vmul.f32 %v797_v55, %v793_v17  ;;  %v802_v15 = vmul.f32 %v797_v55, %v794_v41  ;;  %v800_v60 = vmul.f32 %v797_v55, %v792_v24 }
  0xf5   : > { %v2229_v48 = vsel %vm337_vm8, 1.0, %v2653_v2  ;;  %v839_v41 = vrot.slane %v1873_v26, 6  ;;  %v2237_v17 = vsel %vm338_vm15, 1.0, %v2653_v2  ;;  %v2254_v24 = vperm.slane %v1039_v44, 0 }
  0xf6   : > { %v803_v42 = vadd.f32 %v799_v12, %v753_v45  ;;  %v805_v59 = vadd.f32 %v801_v61, %v755_v6  ;;  %v806_v8 = vadd.f32 %v802_v15, %v756_v39  ;;  %v804_v1 = vadd.f32 %v800_v60, %v754_v7  ;;  %2655 = vst [vmem:[#allocation16_spill] sm:$0xff] %v2229_v48 }
  0xf7   : > { %2657 = vst [vmem:[#allocation18_spill] sm:$0xff] %v2237_v17  ;;  %v843_v45 = vmul.f32 %v2229_v48, %v2220_v4  ;;  %v2242_v39 = vrot.slane %v923_v28, 4  ;;  %v878_v32 = vperm.slane %v2229_v48, 0  ;;  %v840_v55 = vrot.slane %v839_v41, 4 }
  0xf8   : > { %v2148_v35 = vadd.f32 %v809_v62, %v803_v42  ;;  %v2150_v53 = vadd.f32 %v809_v62, %v805_v59  ;;  %v2152_v10 = vadd.f32 %v809_v62, %v806_v8  ;;  %v2160_v25 = vadd.f32 %v809_v62, %v804_v1  ;;  %2658 = vst [vmem:[#allocation19_spill] sm:$0xff] %v2254_v24 }
  0xf9   : > { %v926_v6 = vrot.slane %v925_v19, 4  ;;  %v880_v26 = vperm.slane %v2237_v17, 0  ;;  %v881_v46 = vperm.slane %v2237_v17, 4  ;;  %v1042_v15 = vperm.slane %v2232_v20, 4 }
  0xfa   : > { %820 = vrot.lane.b32.xlu2 %v2152_v10, %s1700_s16  ;;  %818 = vrot.lane.b32.xlu1 %v2150_v53, %s1700_s16  ;;  %v879_v56 = vperm.slane %v2229_v48, 4  ;;  %v844_v9 = vmul.f32 %v2237_v17, %v840_v55  ;;  %v1040_v62 = vperm.slane %v2223_v33, 4  ;;  %v847_v59 = vperm.slane %v843_v45, 0 }
  0xfb   : > { %827 = vrot.lane.b32.xlu0 %v2148_v35, %s1700_s16  ;;  %v930_v42 = vmul.f32 %v2237_v17, %v926_v6  ;;  %v848_v8 = vperm.slane %v843_v45, 4  ;;  %v929_v40 = vmul.f32 %v2229_v48, %v2242_v39  ;;  %v2259_v7 = vperm.slane %v878_v32, 0 }
  0xfc   : > { %v2261_v1 = vperm.slane %v1041_v58, 0  ;;  %v849_v3 = vperm.slane %v844_v9, 0  ;;  %v2274_v2 = vperm.slane %v1040_v62, 0  ;;  %v2278_v28 = vmul.f32 %v2254_v24, %v2160_v25 }
  0xfd   : > { %2659 = vst [vmem:[#allocation20_spill] sm:$0xff] %v2259_v7  ;;  %v935_v41 = vperm.slane %v930_v42, 0  ;;  %v855_v19 = vperm.slane %v847_v59, 0  ;;  %v856_v44 = vperm.slane %v848_v8, 0  ;;  %v933_v45 = vperm.slane %v929_v40, 0 }
  0xfe   : > { %v890_v58 = vmul.f32 %v2259_v7, %v2152_v10  ;;  %v857_v8 = vperm.slane %v849_v3, 0 }
  0xff   : > { %v943_v29 = vperm.slane %v935_v41, 0 }
 0x102   : > { %906 = vrot.lane.b32.xlu2 %v2152_v10, %s1703_s17  ;;  %829 = vrot.lane.b32.xlu1 %v2160_v25, %s1700_s16 }
 0x103   : > { %909 = vrot.lane.b32.xlu0 %v2148_v35, %s1703_s17 }
 0x10a   : > { %950 = vperm.xlu2 %1667, %v1998_v31   ;;  %911 = vrot.lane.b32.xlu1 %v2160_v25, %s1703_s17 }
 0x10b   : > { %895 = vperm.xlu0 %1666, %v1998_v31  }
 0x111   : > { %v2201_v36 = vpop.permute.xlu2 %865 }
 0x112   : > { %1669 = vset.pattern.permute.xlu2 %v2643_v23  ;;  %913 = vrot.lane.b32.xlu1 %v2150_v53, %s1703_s17  ;;  %s322_s17 = scalar_lea.vmem %s2584_s7, %s1606_s29 }
 0x113   : > { %1670 = vset.pattern.permute.xlu0 %v2644_v27  ;;  %978 = vperm.xlu2 %1669, %v1998_v31  }
 0x114   : > { %994 = vperm.xlu0 %1670, %v1998_v31  }
 0x11a   : > { %966 = vperm.xlu1 %1668, %v1998_v31  }
 0x11b   : > { %1672 = vset.pattern.permute.xlu2 %v2645_v22 }
 0x11c   : > { %1056 = vperm.xlu2 %1672, %v1998_v31   ;;  %1676 = vset.pattern.permute.xlu0 %v2646_v30  ;;  %v2268_v30 = vmul.f32 %v2232_v20, %v840_v55 }
 0x11d   : > { %1173 = vperm.xlu0 %1676, %v2182_v49  }
 0x122   : > { %1671 = vset.pattern.permute.xlu1 %v2647_v57 }
 0x123   : > { %1026 = vperm.xlu1 %1671, %v1998_v31  }
 0x124   : > { %1674 = vset.pattern.permute.xlu2 %v2648_v47  ;;  %v2663_v47 = vld [vmem:[#allocation10_spill] sm:$0xff] }
 0x125   : > { %1100 = vperm.xlu2 %1674, %v1998_v31   ;;  %1678 = vset.pattern.permute.xlu0 %v2649_v18  ;;  %v2270_v18 = vperm.slane %v1042_v15, 0  ;;  %v1011_v15 = vperm.slane %v2268_v30, 0 }
 0x12b   : > { %1673 = vset.pattern.permute.xlu1 %v2650_v5 }
 0x12c   : > { %1088 = vperm.xlu1 %1673, %v1998_v31  }
 0x12d   : > { %1675 = vset.pattern.permute.xlu2 %v2651_v11  ;;  %v934_v11 = vperm.slane %v929_v40, 4 }
 0x12e   : > { %1157 = vperm.xlu2 %1675, %v2182_v49  }
 0x12f   : > { %v942_v62 = vperm.slane %v934_v11, 0  ;;  %v941_v11 = vperm.slane %v933_v45, 0 }
 0x134   : > { %1677 = vset.pattern.permute.xlu1 %v2652_v43  ;;  %v2272_v43 = vperm.slane %v879_v56, 0  ;;  %v850_v56 = vperm.slane %v844_v9, 4 }
 0x135   : > { %1228 = vperm.xlu1 %1677, %v2182_v49  }
 0x136   : > { %1680 = vset.pattern.permute.xlu2 %v2644_v27  ;;  %v2265_v27 = vperm.slane %v881_v46, 0  ;;  %2662 = vst [vmem:[#allocation23_spill] sm:$0xff] %v2272_v43  ;;  %v891_v59 = vmul.f32 %v2272_v43, %v2148_v35  ;;  %v858_v48 = vperm.slane %v850_v56, 0 }
 0x138   : > { %2661 = vst [vmem:[#allocation22_spill] sm:$0xff] %v2265_v27  ;;  %v893_v46 = vmul.f32 %v2265_v27, %v2150_v53  ;;  %v1005_v27 = vmul.f32 %v2223_v33, %v2220_v4 }
 0x13d   : > { %1679 = vset.pattern.permute.xlu1 %v2643_v23  ;;  %v2263_v23 = vperm.slane %v880_v26, 0 }
 0x13f   : > { %2660 = vst [vmem:[#allocation21_spill] sm:$0xff] %v2263_v23  ;;  %v892_v26 = vmul.f32 %v2263_v23, %v2160_v25 }
 0x154   : > { %v821_v34 = vpop.permute.xlu2 %820 }
 0x15c   : > { %v2248_v61 = vpop.permute.xlu2 %906 }
 0x164   : > { %v951_v37 = vpop.permute.xlu2 %950 }
 0x16c   : > { %v2203_v14 = vpop.permute.xlu1 %818 }
 0x16d   : > { %v2208_v31 = vpop.permute.xlu0 %827  ;;  %v2284_v32 = vsel %vm564_vm7, %v2203_v14, %v821_v34 }
 0x16e   : > { %v2288_v55 = vsel %vm564_vm7, %v821_v34, %v2208_v31  ;;  %v936_v34 = vperm.slane %v930_v42, 4  ;;  %v859_v50 = vmul.f32 %v855_v19, %v2284_v32  ;;  %v2318_v19 = vmul.f32 %v2232_v20, %v926_v6 }
 0x16f   : > { %v860_v24 = vmul.f32 %v856_v44, %v2288_v55  ;;  %v1009_v20 = vperm.slane %v1005_v27, 0 }
 0x170   : > { %v944_v43 = vperm.slane %v936_v34, 0  ;;  %v868_v7 = vmul.f32 %v2201_v36, %v859_v50 }
 0x174   : > { %v2225_v16 = vpop.permute.xlu1 %829 }
 0x175   : > { %v910_v12 = vpop.permute.xlu0 %909  ;;  %v2305_v9 = vsel %vm564_vm7, %v2208_v31, %v2225_v16 }
 0x176   : > { %v2312_v42 = vsel %vm621_vm11, %v2248_v61, %v910_v12  ;;  %v861_v3 = vmul.f32 %v857_v8, %v2305_v9 }
 0x177   : > { %v945_v6 = vmul.f32 %v941_v11, %v2312_v42 }
 0x17c   : > { %v912_v60 = vpop.permute.xlu1 %911 }
 0x17d   : > { %v2298_v40 = vsel %vm621_vm11, %v910_v12, %v912_v60  ;;  %v896_v21 = vpop.permute.xlu0 %895  ;;  %v869_v12 = vmul.f32 %v2201_v36, %v860_v24  ;;  %v870_v24 = vmul.f32 %v2201_v36, %v861_v3  ;;  %v979_v3 = vpop.permute.xlu2 %978 }
 0x17e   : > { %v946_v31 = vmul.f32 %v942_v62, %v2298_v40  ;;  %v898_v44 = vmul.f32 %v896_v21, %v890_v58  ;;  %v899_v45 = vmul.f32 %v896_v21, %v891_v59  ;;  %v1010_v62 = vperm.slane %v1005_v27, 4 }
 0x17f   : > { %v900_v58 = vmul.f32 %v896_v21, %v892_v26  ;;  %v953_v26 = vmul.f32 %v951_v37, %v945_v6 }
 0x180   : > { %v954_v59 = vmul.f32 %v951_v37, %v946_v31  ;;  %v902_v50 = vadd.f32 %v898_v44, %v868_v7  ;;  %v903_v8 = vadd.f32 %v899_v45, %v869_v12  ;;  %v1019_v45 = vperm.slane %v1011_v15, 0 }
 0x181   : > { %v901_v12 = vmul.f32 %v896_v21, %v893_v46  ;;  %v982_v21 = vmul.f32 %v979_v3, %v2160_v25 }
 0x182   : > { %v957_v17 = vadd.f32 %v953_v26, %v902_v50 }
 0x184   : > { %v914_v23 = vpop.permute.xlu1 %913 }
 0x185   : > { %v2315_v41 = vsel %vm621_vm11, %v912_v60, %v914_v23  ;;  %v832_v60 = vsel %vm564_vm7, %v2225_v16, %v2203_v14  ;;  %v2331_v56 = vsel %vm621_vm11, %v914_v23, %v2248_v61  ;;  %v962_v14 = vmul.f32 %v2305_v9, %v1956_v52 }
 0x186   : > { %v947_v4 = vmul.f32 %v943_v29, %v2315_v41  ;;  %v961_v29 = vmul.f32 %v2288_v55, %v1954_v51  ;;  %v963_v16 = vmul.f32 %v832_v60, %v2025_v63  ;;  %v862_v27 = vmul.f32 %v858_v48, %v832_v60 }
 0x187   : > { %v1067_v61 = vmul.f32 %v2223_v33, %v2242_v39  ;;  %v948_v23 = vmul.f32 %v944_v43, %v2331_v56  ;;  %v904_v51 = vadd.f32 %v900_v58, %v870_v24  ;;  %v958_v52 = vadd.f32 %v954_v59, %v903_v8 }
 0x188   : > { %v955_v34 = vmul.f32 %v951_v37, %v947_v4  ;;  %v964_v63 = vmul.f32 %v2284_v32, %v2663_v47  ;;  %v1017_v48 = vperm.slane %v1009_v20, 0  ;;  %v1018_v4 = vperm.slane %v1010_v62, 0  ;;  %v995_v20 = vpop.permute.xlu0 %994 }
 0x189   : > { %v871_v39 = vmul.f32 %v2201_v36, %v862_v27  ;;  %v956_v33 = vmul.f32 %v951_v37, %v948_v23  ;;  %v981_v58 = vmul.f32 %v979_v3, %v2148_v35  ;;  %v1071_v15 = vperm.slane %v1067_v61, 0 }
 0x18a   : > { %v959_v6 = vadd.f32 %v955_v34, %v904_v51  ;;  %v990_v47 = vmul.f32 %v2315_v41, %v2045_v13  ;;  %v983_v59 = vmul.f32 %v979_v3, %v2150_v53  ;;  %v1021_v37 = vmul.f32 %v1017_v48, %v2305_v9 }
 0x18b   : > { %v905_v46 = vadd.f32 %v901_v12, %v871_v39  ;;  %v989_v36 = vmul.f32 %v2298_v40, %v2043_v0  ;;  %v1022_v50 = vmul.f32 %v1018_v4, %v832_v60  ;;  %v1072_v34 = vperm.slane %v1067_v61, 4 }
 0x18c   : > { %v967_v11 = vpop.permute.xlu1 %966  ;;  %v998_v23 = vmul.f32 %v995_v20, %v990_v47  ;;  %v1079_v12 = vperm.slane %v1071_v15, 0 }
 0x18d   : > { %v969_v31 = vmul.f32 %v967_v11, %v961_v29  ;;  %v970_v7 = vmul.f32 %v967_v11, %v962_v14  ;;  %v971_v44 = vmul.f32 %v967_v11, %v963_v16  ;;  %v1073_v29 = vperm.slane %v2318_v19, 0 }
 0x18e   : > { %v972_v62 = vmul.f32 %v967_v11, %v964_v63  ;;  %v960_v8 = vadd.f32 %v956_v33, %v905_v46  ;;  %v1023_v16 = vmul.f32 %v1019_v45, %v2284_v32  ;;  %v997_v13 = vmul.f32 %v995_v20, %v989_v36 }
 0x18f   : > { %v973_v43 = vadd.f32 %v969_v31, %v957_v17  ;;  %v974_v57 = vadd.f32 %v970_v7, %v958_v52  ;;  %v975_v24 = vadd.f32 %v971_v44, %v959_v6  ;;  %v991_v17 = vmul.f32 %v2331_v56, %v2047_v38  ;;  %v1057_v44 = vpop.permute.xlu2 %1056 }
 0x190   : > { %v976_v11 = vadd.f32 %v972_v62, %v960_v8  ;;  %v2664_v31 = vperm.slane %v2268_v30, 4  ;;  %v1074_v7 = vperm.slane %v2318_v19, 4  ;;  %v984_v33 = vmul.f32 %v979_v3, %v2152_v10 }
 0x191   : > { %v985_v14 = vadd.f32 %v981_v58, %v973_v43  ;;  %v986_v25 = vadd.f32 %v982_v21, %v974_v57  ;;  %v987_v27 = vadd.f32 %v983_v59, %v975_v24  ;;  %v999_v38 = vmul.f32 %v995_v20, %v991_v17 }
 0x192   : > { %v1020_v0 = vperm.slane %v2664_v31, 0  ;;  %v1081_v57 = vperm.slane %v1073_v29, 0  ;;  %v1052_v45 = vmul.f32 %v2274_v2, %v2150_v53  ;;  %v1080_v52 = vperm.slane %v1072_v34, 0  ;;  %v1174_v31 = vpop.permute.xlu0 %1173 }
 0x193   : > { %v1001_v32 = vadd.f32 %v997_v13, %v985_v14  ;;  %v1002_v61 = vadd.f32 %v998_v23, %v986_v25  ;;  %v1003_v63 = vadd.f32 %v999_v38, %v987_v27  ;;  %v992_v30 = vmul.f32 %v2312_v42, %v2049_v54 }
 0x194   : > { %v988_v48 = vadd.f32 %v984_v33, %v976_v11  ;;  %v1024_v6 = vmul.f32 %v1020_v0, %v2288_v55  ;;  %v1053_v3 = vmul.f32 %v2261_v1, %v2152_v10  ;;  %v1082_v39 = vperm.slane %v1074_v7, 0  ;;  %v2668_v7 = vld [vmem:[#allocation9_spill] sm:$0xff] }
 0x195   : > { %v1027_v26 = vpop.permute.xlu1 %1026  ;;  %v1085_v58 = vmul.f32 %v1081_v57, %v2312_v42  ;;  %v1059_v53 = vmul.f32 %v1057_v44, %v2278_v28  ;;  %v1060_v29 = vmul.f32 %v1057_v44, %v1052_v45  ;;  %v1000_v15 = vmul.f32 %v995_v20, %v992_v30  ;;  %v2670_v57 = vld [vmem:[#allocation3_spill] sm:$0xff] }
 0x196   : > { %v1029_v51 = vmul.f32 %v1027_v26, %v1021_v37  ;;  %v1030_v9 = vmul.f32 %v1027_v26, %v1022_v50  ;;  %v1031_v60 = vmul.f32 %v1027_v26, %v1023_v16  ;;  %v1061_v24 = vmul.f32 %v1057_v44, %v1053_v3  ;;  %v2674_v3 = vld [vmem:[#allocation16_spill] sm:$0xff] }
 0x197   : > { %v1083_v21 = vmul.f32 %v1079_v12, %v2315_v41  ;;  %v1084_v54 = vmul.f32 %v1080_v52, %v2331_v56  ;;  %v1032_v46 = vmul.f32 %v1027_v26, %v1024_v6  ;;  %v1004_v47 = vadd.f32 %v1000_v15, %v988_v48  ;;  %v1101_v20 = vpop.permute.xlu2 %1100  ;;  %v2672_v48 = vld [vmem:[#allocation20_spill] sm:$0xff] }
 0x198   : > { %v1033_v4 = vadd.f32 %v1029_v51, %v1001_v32  ;;  %v1034_v19 = vadd.f32 %v1030_v9, %v1002_v61  ;;  %v1035_v43 = vadd.f32 %v1031_v60, %v1003_v63  ;;  %v1054_v42 = vmul.f32 %v2270_v18, %v2148_v35  ;;  %v2669_v60 = vld [vmem:[#allocation8_spill] sm:$0xff]  ;;  %v2671_v63 = vld [vmem:[#allocation18_spill] sm:$0xff] }
 0x199   : > { %v1086_v28 = vmul.f32 %v1082_v39, %v2298_v40  ;;  %v1036_v50 = vadd.f32 %v1032_v46, %v1004_v47  ;;  %v2665_v26 = vmov 6   ;;  %v2666_v23 = vmov 9   ;;  %v2678_v47 = vld [vmem:[#allocation15_spill] sm:$0xff] }
 0x19a   : > { %v1063_v55 = vadd.f32 %v1059_v53, %v1033_v4  ;;  %v1064_v59 = vadd.f32 %v1060_v29, %v1034_v19  ;;  %v1065_v17 = vadd.f32 %v1061_v24, %v1035_v43  ;;  %v1062_v56 = vmul.f32 %v1057_v44, %v1054_v42  ;;  %v2673_v19 = vld [vmem:[#allocation23_spill] sm:$0xff]  ;;  %v2676_v29 = vld [vmem:[#allocation21_spill] sm:$0xff] }
 0x19b   : > { %v1201_v38 = vrot.slane %v2668_v7, 5  ;;  %v1203_v33 = vrot.slane %v2669_v60, 5  ;;  %v1129_v44 = vrot.slane %v2670_v57, 5  ;;  %v2677_v24 = vld [vmem:[#allocation17_spill] sm:$0xff] }
 0x19c   : > { %v1066_v27 = vadd.f32 %v1062_v56, %v1036_v50 }
 0x19d   : > { %v1202_v32 = vrot.slane %v1201_v38, 4  ;;  %v1204_v45 = vrot.slane %v1203_v33, 4  ;;  %v1130_v52 = vrot.slane %v1129_v44, 4 }
 0x19e   : > { %v1089_v62 = vpop.permute.xlu1 %1088 }
 0x19f   : > { %v1091_v37 = vmul.f32 %v1089_v62, %v1083_v21  ;;  %v1092_v10 = vmul.f32 %v1089_v62, %v1084_v54  ;;  %v1093_v36 = vmul.f32 %v1089_v62, %v1085_v58  ;;  %v1094_v25 = vmul.f32 %v1089_v62, %v1086_v28  ;;  %v2411_v11 = vpop.permute.xlu2 %1157  ;;  %v2675_v58 = vld [vmem:[#allocation22_spill] sm:$0xff] }
 0x1a0   : > { %v1207_v39 = vmul.f32 %v2674_v3, %v1202_v32  ;;  %v1208_v43 = vmul.f32 %v2671_v63, %v1204_v45  ;;  %v1332_v21 = vmul.f32 %v2677_v24, %v1204_v45  ;;  %v1283_v62 = vmul.f32 %v2678_v47, %v1130_v52 }
 0x1a1   : > { %v1095_v8 = vadd.f32 %v1091_v37, %v1063_v55  ;;  %v1096_v41 = vadd.f32 %v1092_v10, %v1064_v59  ;;  %v1097_v14 = vadd.f32 %v1093_v36, %v1065_v17  ;;  %v1098_v35 = vadd.f32 %v1094_v25, %v1066_v27  ;;  %v2679_v10 = vld [vmem:[#allocation19_spill] sm:$0xff] }
 0x1a2   : > { %v1135_v17 = vmul.f32 %v2674_v3, %v1130_v52  ;;  %v1211_v28 = vperm.slane %v1207_v39, 0  ;;  %v1214_v50 = vperm.slane %v1208_v43, 4  ;;  %v1287_v27 = vperm.slane %v1283_v62, 0  ;;  %v2486_v3 = vld [vmem:[%s2582_s5] sm:$0xff] }
 0x1a3   : > { %v2375_v16 = vadd.f32 %v1101_v20, %v1095_v8  ;;  %v2377_v34 = vadd.f32 %v1101_v20, %v1096_v41  ;;  %v2379_v13 = vadd.f32 %v1101_v20, %v1097_v14  ;;  %v2387_v40 = vadd.f32 %v1101_v20, %v1098_v35 }
 0x1a4   : > { %v1213_v20 = vperm.slane %v1208_v43, 0  ;;  %v1337_v41 = vperm.slane %v1332_v21, 0  ;;  %v1212_v35 = vperm.slane %v1207_v39, 4  ;;  %v1140_v7 = vperm.slane %v1135_v17, 4 }
 0x1a5   : > { %1110 = vrot.lane.b32.xlu2 %v2379_v13, %s1697_s12  ;;  %1119 = vrot.lane.b32.xlu0 %v2375_v16, %s1697_s12  ;;  %v1168_v4 = vmul.f32 %v2387_v40, %v2672_v48  ;;  %v1169_v6 = vmul.f32 %v2375_v16, %v2673_v19  ;;  %v1171_v53 = vmul.f32 %v2379_v13, %v2675_v58  ;;  %v1219_v38 = vperm.slane %v1211_v28, 0 }
 0x1a6   : > { %1121 = vrot.lane.b32.xlu1 %v2377_v34, %s1697_s12  ;;  %v1170_v15 = vmul.f32 %v2377_v34, %v2676_v29  ;;  %v2438_v55 = vmul.f32 %v2379_v13, %v2274_v2  ;;  %v2444_v37 = vmul.f32 %v2387_v40, %v2261_v1  ;;  %v2448_v36 = vmul.f32 %v2377_v34, %v2679_v10 }
 0x1a7   : > { %v2415_v9 = vpop.permute.xlu1 %1228  ;;  %v2440_v59 = vmul.f32 %v1174_v31, %v1168_v4  ;;  %v2451_v42 = vmul.f32 %v1174_v31, %v1169_v6  ;;  %v1179_v2 = vmul.f32 %v1174_v31, %v1171_v53  ;;  %v2455_v56 = vmul.f32 %v2375_v16, %v2270_v18 }
 0x1a8   : > { %v1178_v8 = vmul.f32 %v1174_v31, %v1170_v15  ;;  %v1139_v31 = vperm.slane %v1135_v17, 0  ;;  %v1288_v60 = vperm.slane %v1283_v62, 4  ;;  %v1221_v18 = vperm.slane %v1213_v20, 0 }
 0x1a9   : > { %v1222_v33 = vperm.slane %v1214_v50, 0  ;;  %v1338_v57 = vperm.slane %v1332_v21, 4  ;;  %v2466_v44 = vmul.f32 %v2678_v47, %v1202_v32  ;;  %v2481_v4 = vperm.slane %v1287_v27, 0 }
 0x1aa   : > { %v1220_v19 = vperm.slane %v1212_v35, 0  ;;  %v1147_v32 = vperm.slane %v1139_v31, 0  ;;  %v1148_v6 = vperm.slane %v1140_v7, 0  ;;  %v1296_v29 = vperm.slane %v1288_v60, 0  ;;  %v2681_v35 = vld [vmem:[#allocation4_spill] sm:$0xff] }
 0x1ab   : > { %v2496_v15 = vperm.slane %v1338_v57, 0  ;;  %v1335_v21 = vperm.slane %v2466_v44, 0  ;;  %v1336_v10 = vperm.slane %v2466_v44, 4 }
 0x1ad   : > { %1184 = vrot.lane.b32.xlu2 %v2387_v40, %s1707_s19  ;;  %1189 = vrot.lane.b32.xlu0 %v2377_v34, %s1707_s19 }
 0x1ae   : > { %1191 = vrot.lane.b32.xlu1 %v2379_v13, %s1707_s19 }
 0x1b5   : > { %1187 = vrot.lane.b32.xlu2 %v2375_v16, %s1707_s19  ;;  %1244 = vperm.xlu0 %1678, %v2182_v49  }
 0x1b6   : > { %1112 = vrot.lane.b32.xlu1 %v2387_v40, %s1697_s12 }
 0x1bd   : > { %1272 = vperm.xlu2 %1680, %v2182_v49   ;;  %1683 = vset.pattern.permute.xlu0 %v2650_v5 }
 0x1be   : > { %1256 = vperm.xlu1 %1679, %v2182_v49   ;;  %1352 = vperm.xlu0 %1683, %v2182_v49  }
 0x1c5   : > { %1682 = vset.pattern.permute.xlu2 %v2645_v22  ;;  %v2667_v22 = vld [vmem:[#allocation2_spill] sm:$0xff] }
 0x1c6   : > { %1681 = vset.pattern.permute.xlu1 %v2665_v26  ;;  %1320 = vperm.xlu2 %1682, %v2182_v49   ;;  %v1131_v0 = vrot.slane %v2667_v22, 5 }
 0x1c7   : > { %1304 = vperm.xlu1 %1681, %v2182_v49  }
 0x1ce   : > { %1685 = vset.pattern.permute.xlu2 %v2650_v5  ;;  %v1132_v5 = vrot.slane %v1131_v0, 4 }
 0x1cf   : > { %1684 = vset.pattern.permute.xlu1 %v2666_v23  ;;  %1374 = vperm.xlu2 %1685, %v2486_v3  }
 0x1d0   : > { %1364 = vperm.xlu1 %1684, %v2182_v49   ;;  %v1136_v30 = vmul.f32 %v2671_v63, %v1132_v5  ;;  %v2474_v63 = vperm.slane %v1337_v41, 0  ;;  %v1284_v58 = vmul.f32 %v2677_v24, %v1132_v5 }
 0x1d2   : > { %v1141_v54 = vperm.slane %v1136_v30, 0  ;;  %v1142_v46 = vperm.slane %v1136_v30, 4  ;;  %v1289_v41 = vperm.slane %v1284_v58, 0 }
 0x1d4   : > { %v1149_v1 = vperm.slane %v1141_v54, 0  ;;  %v1150_v25 = vperm.slane %v1142_v46, 0 }
 0x1ff   : > { %v2413_v51 = vpop.permute.xlu2 %1110 }
 0x207   : > { %v1185_v49 = vpop.permute.xlu2 %1184 }
 0x20f   : > { %v1188_v23 = vpop.permute.xlu2 %1187 }
 0x217   : > { %v2421_v61 = vpop.permute.xlu0 %1119 }
 0x218   : > { %v1122_v12 = vpop.permute.xlu1 %1121 }
 0x219   : > { %v2459_v22 = vsel %vm458_vm0, %v2421_v61, %v1122_v12  ;;  %v2463_v0 = vsel %vm458_vm0, %v1122_v12, %v2413_v51  ;;  %v2477_v12 = vsel %vm717_vm14, %v1185_v49, %v1188_v23 }
 0x21a   : > { %v1153_v30 = vmul.f32 %v1149_v1, %v2459_v22  ;;  %v1154_v48 = vmul.f32 %v1150_v25, %v2463_v0  ;;  %v1223_v53 = vmul.f32 %v1219_v38, %v2477_v12  ;;  %v1290_v25 = vperm.slane %v1284_v58, 4  ;;  %v2682_v38 = vld [vmem:[#allocation7_spill] sm:$0xff] }
 0x21b   : > { %v1241_v60 = vmul.f32 %v2463_v0, %v2682_v38  ;;  %v1300_v38 = vmul.f32 %v1296_v29, %v2463_v0 }
 0x21c   : > { %v1162_v46 = vmul.f32 %v2411_v11, %v1153_v30  ;;  %v1163_v47 = vmul.f32 %v2411_v11, %v1154_v48 }
 0x21e   : > { %v1182_v31 = vadd.f32 %v1178_v8, %v1162_v46  ;;  %v1183_v7 = vadd.f32 %v1179_v2, %v1163_v47  ;;  %v1343_v47 = vperm.slane %v1335_v21, 0 }
 0x21f   : > { %v1190_v26 = vpop.permute.xlu0 %1189 }
 0x220   : > { %v1192_v14 = vpop.permute.xlu1 %1191  ;;  %v2489_v39 = vsel %vm717_vm14, %v1188_v23, %v1190_v26  ;;  %v1231_v23 = vmul.f32 %v2415_v9, %v1223_v53 }
 0x221   : > { %v2469_v45 = vsel %vm717_vm14, %v1190_v26, %v1192_v14  ;;  %v2472_v52 = vsel %vm717_vm14, %v1192_v14, %v1185_v49  ;;  %v1224_v24 = vmul.f32 %v1220_v19, %v2489_v39  ;;  %v2680_v14 = vld [vmem:[#allocation5_spill] sm:$0xff] }
 0x222   : > { %v1225_v49 = vmul.f32 %v1221_v18, %v2469_v45  ;;  %v1226_v43 = vmul.f32 %v1222_v33, %v2472_v52  ;;  %v1273_v18 = vpop.permute.xlu2 %1272  ;;  %v2683_v33 = vld [vmem:[#allocation6_spill] sm:$0xff] }
 0x223   : > { %v1240_v57 = vmul.f32 %v2459_v22, %v2683_v33  ;;  %v1232_v44 = vmul.f32 %v2415_v9, %v1224_v24  ;;  %v1350_v33 = vmul.f32 %v2496_v15, %v2489_v39 }
 0x224   : > { %v1233_v20 = vmul.f32 %v2415_v9, %v1225_v49  ;;  %v1234_v50 = vmul.f32 %v2415_v9, %v1226_v43 }
 0x226   : > { %v1237_v48 = vadd.f32 %v1233_v20, %v1182_v31  ;;  %v1238_v19 = vadd.f32 %v1234_v50, %v1183_v7  ;;  %v2686_v50 = vld [vmem:[#allocation14_spill] sm:$0xff]  ;;  %v1299_v7 = vmul.f32 %v2481_v4, %v2459_v22 }
 0x227   : > { %v1245_v1 = vpop.permute.xlu0 %1244 }
 0x228   : > { %v1113_v54 = vpop.permute.xlu1 %1112  ;;  %v1248_v49 = vmul.f32 %v1245_v1, %v1240_v57 }
 0x229   : > { %v2503_v62 = vsel %vm458_vm0, %v2413_v51, %v1113_v54  ;;  %v2507_v5 = vsel %vm458_vm0, %v1113_v54, %v2421_v61  ;;  %vm1377_vm0 = vcmask 64512  }
 0x22a   : > { %v1151_v17 = vmul.f32 %v1147_v32, %v2503_v62  ;;  %v1152_v28 = vmul.f32 %v1148_v6, %v2507_v5  ;;  %v1242_v51 = vmul.f32 %v2503_v62, %v2680_v14  ;;  %v1239_v26 = vmul.f32 %v2507_v5, %v2681_v35 }
 0x22b   : > { %v1249_v32 = vmul.f32 %v1245_v1, %v1241_v60  ;;  %v1269_v14 = vmul.f32 %v2472_v52, %v2686_v50 }
 0x22c   : > { %v1160_v61 = vmul.f32 %v2411_v11, %v1151_v17  ;;  %v1161_v27 = vmul.f32 %v2411_v11, %v1152_v28  ;;  %v1250_v6 = vmul.f32 %v1245_v1, %v1242_v51  ;;  %v1247_v43 = vmul.f32 %v1245_v1, %v1239_v26  ;;  %v2685_v28 = vld [vmem:[#allocation13_spill] sm:$0xff]  ;;  %v2687_v1 = vld [vmem:[#allocation12_spill] sm:$0xff] }
 0x22d   : > { %v1268_v20 = vmul.f32 %v2469_v45, %v2685_v28  ;;  %v1253_v51 = vadd.f32 %v1249_v32, %v1237_v48 }
 0x22e   : > { %v1180_v30 = vadd.f32 %v2440_v59, %v1160_v61  ;;  %v1181_v11 = vadd.f32 %v2451_v42, %v1161_v27  ;;  %v2684_v59 = vld [vmem:[#allocation11_spill] sm:$0xff]  ;;  %v1297_v61 = vperm.slane %v1289_v41, 0  ;;  %v1277_v41 = vmul.f32 %v1273_v18, %v1269_v14 }
 0x22f   : > { %v1267_v42 = vmul.f32 %v2489_v39, %v2684_v59 }
 0x230   : > { %v1235_v8 = vadd.f32 %v1231_v23, %v1180_v30  ;;  %v1236_v2 = vadd.f32 %v1232_v44, %v1181_v11  ;;  %v1257_v58 = vpop.permute.xlu1 %1256  ;;  %v1349_v23 = vmul.f32 %v2474_v63, %v2477_v12  ;;  %v1321_v44 = vpop.permute.xlu2 %1320  ;;  %v1301_v30 = vmul.f32 %v1297_v61, %v2503_v62 }
 0x231   : > { %v1259_v53 = vmul.f32 %v1257_v58, %v2375_v16  ;;  %v1260_v54 = vmul.f32 %v1257_v58, %v2377_v34  ;;  %v1261_v46 = vmul.f32 %v1257_v58, %v2379_v13  ;;  %v1262_v9 = vmul.f32 %v1257_v58, %v2387_v40  ;;  %v1353_v29 = vpop.permute.xlu0 %1352 }
 0x232   : > { %v1251_v24 = vadd.f32 %v1247_v43, %v1235_v8  ;;  %v1252_v17 = vadd.f32 %v1248_v49, %v1236_v2  ;;  %v1254_v16 = vadd.f32 %v1250_v6, %v1238_v19  ;;  %v1270_v34 = vmul.f32 %v2477_v12, %v2687_v1 }
 0x233   : > { %v1344_v13 = vperm.slane %v1336_v10, 0  ;;  %v1298_v40 = vperm.slane %v1290_v25, 0  ;;  %v1265_v26 = vadd.f32 %v1261_v46, %v1253_v51  ;;  %v1275_v60 = vmul.f32 %v1273_v18, %v1267_v42 }
 0x234   : > { %v1263_v27 = vadd.f32 %v1259_v53, %v1251_v24  ;;  %v1264_v35 = vadd.f32 %v1260_v54, %v1252_v17  ;;  %v1266_v21 = vadd.f32 %v1262_v9, %v1254_v16  ;;  %v1278_v31 = vmul.f32 %v1273_v18, %v1270_v34 }
 0x235   : > { %v1276_v10 = vmul.f32 %v1273_v18, %v1268_v20  ;;  %v1347_v25 = vmul.f32 %v1343_v47, %v2469_v45  ;;  %v1348_v57 = vmul.f32 %v1344_v13, %v2472_v52  ;;  %v1302_v63 = vmul.f32 %v1298_v40, %v2507_v5 }
 0x236   : > { %v1279_v11 = vadd.f32 %v1275_v60, %v1263_v27  ;;  %v1281_v4 = vadd.f32 %v1277_v41, %v1265_v26  ;;  %v1282_v0 = vadd.f32 %v1278_v31, %v1266_v21  ;;  %v1323_v18 = vmul.f32 %v1321_v44, %v2448_v36 }
 0x237   : > { %v1280_v22 = vadd.f32 %v1276_v10, %v1264_v35  ;;  %v1324_v45 = vmul.f32 %v1321_v44, %v2438_v55  ;;  %v1325_v52 = vmul.f32 %v1321_v44, %v2444_v37  ;;  %v1326_v62 = vmul.f32 %v1321_v44, %v2455_v56 }
 0x238   : > { %v1355_v8 = vmul.f32 %v1353_v29, %v1347_v25  ;;  %v1356_v2 = vmul.f32 %v1353_v29, %v1348_v57  ;;  %v1357_v43 = vmul.f32 %v1353_v29, %v1349_v23  ;;  %v1358_v58 = vmul.f32 %v1353_v29, %v1350_v33  ;;  %v1375_v28 = vpop.permute.xlu2 %1374 }
 0x239   : > { %v1305_v12 = vpop.permute.xlu1 %1304 }
 0x23a   : > { %v1307_v48 = vmul.f32 %v1305_v12, %v1299_v7  ;;  %v1308_v19 = vmul.f32 %v1305_v12, %v1300_v38  ;;  %v1309_v39 = vmul.f32 %v1305_v12, %v1301_v30  ;;  %v1310_v15 = vmul.f32 %v1305_v12, %v1302_v63 }
 0x23c   : > { %v1311_v32 = vadd.f32 %v1307_v48, %v1279_v11  ;;  %v1312_v5 = vadd.f32 %v1308_v19, %v1280_v22  ;;  %v1313_v6 = vadd.f32 %v1309_v39, %v1281_v4  ;;  %v1314_v49 = vadd.f32 %v1310_v15, %v1282_v0 }
 0x23e   : > { %v1327_v53 = vadd.f32 %v1323_v18, %v1311_v32  ;;  %v1328_v54 = vadd.f32 %v1324_v45, %v1312_v5  ;;  %v1329_v46 = vadd.f32 %v1325_v52, %v1313_v6  ;;  %v1330_v9 = vadd.f32 %v1326_v62, %v1314_v49 }
 0x240   : > { %v1359_v59 = vadd.f32 %v1355_v8, %v1327_v53  ;;  %v1360_v36 = vadd.f32 %v1356_v2, %v1328_v54  ;;  %v1361_v42 = vadd.f32 %v1357_v43, %v1329_v46  ;;  %v1362_v55 = vadd.f32 %v1358_v58, %v1330_v9 }
 0x242   : > { %v1365_v37 = vpop.permute.xlu1 %1364 }
 0x243   : > { %v1367_v47 = vadd.f32 %v1365_v37, %v1359_v59  ;;  %v1368_v56 = vadd.f32 %v1365_v37, %v1360_v36  ;;  %v1369_v24 = vadd.f32 %v1365_v37, %v1361_v42  ;;  %v1370_v17 = vadd.f32 %v1365_v37, %v1362_v55 }
 0x245   : > { %1395 = vmatpush.msra.mxu0 %v1367_v47  ;;  %1415 = vmatpush.msra.mxu1 %v1368_v56 }
 0x246   : > { %1435 = vmatpush.msra.mxu2 %v1369_v24  ;;  %1455 = vmatpush.msra.mxu3 %v1370_v17 }
 0x247   : > { %1622 = vmatmul.msk.f32.vlgmr.msra.gmra.mxu2 %vm1377_vm0, %v2486_v3  ;;  %1623 = vmatmul.msk.f32.vlgmr.msra.gmra.mxu3 %vm1377_vm0, %v2486_v3 }
 0x248   : > { %1620 = vmatmul.msk.f32.vlgmr.msra.gmra.mxu0 %vm1377_vm0, %v2486_v3  ;;  %1621 = vmatmul.msk.f32.vlgmr.msra.gmra.mxu1 %vm1377_vm0, %v2486_v3 }
 0x2c5   : > { %v1397_v20 = vpop.f32.mrf.mxu0  ;;  %v1417_v50 = vpop.f32.mrf.mxu1 }
 0x2c6   : > { %v1398_v14 = vadd.f32 %v1397_v20, %v1375_v28  ;;  %v1418_v51 = vadd.f32 %v1417_v50, %v1375_v28 }
 0x2c8   : > { %1460 = vst [vmem:[%s318_s14] sm:$0xff] %v1398_v14  ;;  %v1470_v16 = vmul.f32 %v1398_v14, %v1398_v14  ;;  %v1471_v1 = vmul.f32 %v1418_v51, %v1418_v51  ;;  %v1464_v34 = vadd.f32 %v1418_v51, %v1398_v14 }
 0x2c9   : > { %1461 = vst [vmem:[%s318_s14 + $0x8] sm:$0xff] %v1418_v51 }
 0x2ca   : > { %v1437_v13 = vpop.f32.mrf.mxu2  ;;  %v1457_v61 = vpop.f32.mrf.mxu3  ;;  %v1474_v27 = vadd.f32 %v1471_v1, %v1470_v16 }
 0x2cb   : > { %v1438_v40 = vadd.f32 %v1437_v13, %v1375_v28  ;;  %v1458_v3 = vadd.f32 %v1457_v61, %v1375_v28 }
 0x2cd   : > { %1462 = vst [vmem:[%s318_s14 + $0x10] sm:$0xff] %v1438_v40  ;;  %v1472_v35 = vmul.f32 %v1438_v40, %v1438_v40  ;;  %v1465_v26 = vadd.f32 %v1464_v34, %v1438_v40  ;;  %v1473_v23 = vmul.f32 %v1458_v3, %v1458_v3 }
 0x2ce   : > { %1463 = vst [vmem:[%s318_s14 + $0x18] sm:$0xff] %v1458_v3 }
 0x2cf   : > { %v1466_v21 = vadd.f32 %v1465_v26, %v1458_v3  ;;  %v1475_v31 = vadd.f32 %v1474_v27, %v1472_v35 }
 0x2d1   : > { %1467 = vadd.xlane.f32.xlu1 %v1466_v21  ;;  %v1476_v7 = vadd.f32 %v1475_v31, %v1473_v23 }
 0x2d3   : > { %1477 = vadd.xlane.f32.xlu2 %v1476_v7 }
 0x344   : > { %v1468_v38 = vpop.xlane.xlu1 %1467 }
 0x345   : > { %1469 = vst.msk [vmem:[%s322_s17] sm:$0xff] %vm564_vm7, %v1468_v38 }
 0x346   : > { %v1478_v60 = vpop.xlane.xlu2 %1477 }
 0x347   : > { %1479 = vst.msk [vmem:[%s326_s20] sm:$0xff] %vm564_vm7, %v1478_v60 }
 0x348 PF: > { %s19_s27 = sadd.s32 1, %s1692_s27  }
 0x349   : > { %p16_p4 = scmp.ge.s32.totalorder %s19_s27, 4  }
 0x34b   :  { %18 = sbr.rel (!%p16_p4) target bundleno = 1 (0x1), region = 98 }

</bundles_post_ra>
